<compile_context>
chip_gen: v7x
topology: tpu7x:2x2x1
jax: 0.10.0
libtpu: 0.0.40
codegen_flags: <defaults>
</compile_context>

<pallas_src>
import functools
import math

import jax
import jax.numpy as jnp
from jax.experimental import pallas as pl
from jax.experimental.pallas import tpu as pltpu

# ------------------------- model hyper-parameters ---------------------------
D_MODEL = 80
NHEAD = 2
HEAD_DIM = D_MODEL // NHEAD          # 40
DIM_FF = 1024
NUM_CLASSES = 2
LN_EPS = 1e-5

# ------------------------- TPU-friendly padded dims -------------------------
D_PAD = 128                          # lane-padded model dim
HEAD_PAD = 128                       # lane-padded per-head dim
OUT_PAD = 128                        # lane-padded logits dim
MAX_TILE_B = 256                     # keeps (tile*S, 1024) f32 FFN act small even at 64 MiB VMEM (v7x)


def _layernorm_padded(x, g, b):
    """LayerNorm over the true D_MODEL columns of a (rows, D_PAD) f32 array.

    Padded columns of x / g / b are zero, so sums over the 128 lanes equal sums
    over the real 80 features, and the output keeps zeros in the padded lanes.
    """
    inv_d = 1.0 / float(D_MODEL)
    mu = jnp.sum(x, axis=-1, keepdims=True) * inv_d
    var = jnp.sum(x * x, axis=-1, keepdims=True) * inv_d - mu * mu
    return (x - mu) * jax.lax.rsqrt(var + LN_EPS) * g + b


def ciform_kernel(
    x_ref, pe_ref,
    wq_ref, bq_ref, wk_ref, bk_ref, wv_ref, bv_ref, wo_ref, bo_ref,
    ln1g_ref, ln1b_ref,
    w1_ref, b1_ref, w2_ref, b2_ref,
    ln2g_ref, ln2b_ref,
    wp1_ref, bp1_ref, wp2_ref, bp2_ref,
    out_ref,
):
    bt, seq, dp = x_ref.shape
    rows = bt * seq

    x = x_ref[...]                                    # (bt, S, 128) f32, pads zero
    pe = pe_ref[...]                                  # (S, 128)     f32, pads zero

    # ---- positional encoding (dropout == identity in eval) ----
    h = (x + pe[None, :, :]).reshape(rows, dp)        # f32 residual stream
    h_bf = h.astype(jnp.bfloat16)

    # ---- multi-head self-attention (per-head lane-aligned weights) ----
    attn = bo_ref[...]                                # (1, 128) f32, broadcasts over rows
    for hi in range(NHEAD):                           # static 2-iteration loop, unrolled at trace
        # 1/sqrt(head_dim) is folded into wq/bq at pack time.
        q = jnp.dot(h_bf, wq_ref[hi], preferred_element_type=jnp.float32) + bq_ref[hi]
        k = jnp.dot(h_bf, wk_ref[hi], preferred_element_type=jnp.float32) + bk_ref[hi]
        v = jnp.dot(h_bf, wv_ref[hi], preferred_element_type=jnp.float32) + bv_ref[hi]
        q3 = q.reshape(bt, seq, HEAD_PAD).astype(jnp.bfloat16)
        k3 = k.reshape(bt, seq, HEAD_PAD).astype(jnp.bfloat16)
        v3 = v.reshape(bt, seq, HEAD_PAD).astype(jnp.bfloat16)

        scores = jnp.einsum('bqd,bkd->bqk', q3, k3,
                            preferred_element_type=jnp.float32)       # (bt, S, S) f32
        m = jnp.max(scores, axis=-1, keepdims=True)
        p = jnp.exp(scores - m)
        denom = jnp.sum(p, axis=-1, keepdims=True)
        p = p * pl.reciprocal(denom, approx=True)

        ctx = jnp.einsum('bqk,bkd->bqd', p.astype(jnp.bfloat16), v3,
                         preferred_element_type=jnp.float32)           # (bt, S, 128)
        attn = attn + jnp.dot(ctx.reshape(rows, HEAD_PAD).astype(jnp.bfloat16),
                              wo_ref[hi], preferred_element_type=jnp.float32)

    # residual + LayerNorm1 (post-LN, f32)
    h1 = _layernorm_padded(h + attn, ln1g_ref[...], ln1b_ref[...])

    # ---- feed-forward (2-D bf16 dots, f32 accumulation) ----
    ff = jnp.dot(h1.astype(jnp.bfloat16), w1_ref[...],
                 preferred_element_type=jnp.float32) + b1_ref[...]
    ff = jnp.maximum(ff, 0.0)
    ff = jnp.dot(ff.astype(jnp.bfloat16), w2_ref[...],
                 preferred_element_type=jnp.float32) + b2_ref[...]

    # residual + LayerNorm2
    h2 = _layernorm_padded(h1 + ff, ln2g_ref[...], ln2b_ref[...])

    # ---- mean pool over the true sequence length ----
    pooled = jnp.sum(h2.reshape(bt, seq, dp), axis=1) * (1.0 / float(seq))   # (bt, 128)

    # ---- prediction head: Linear -> ReLU -> Linear (lane-padded logits) ----
    z = jnp.dot(pooled.astype(jnp.bfloat16), wp1_ref[...],
                preferred_element_type=jnp.float32) + bp1_ref[...]
    z = jnp.maximum(z, 0.0)
    logits = jnp.dot(z.astype(jnp.bfloat16), wp2_ref[...],
                     preferred_element_type=jnp.float32) + bp2_ref[...]

    out_ref[...] = logits.astype(out_ref.dtype)


# --------------------------- host-side preparation ---------------------------
@functools.lru_cache(maxsize=8)
def _make_pe_padded(seq_len):
    position = jnp.arange(seq_len, dtype=jnp.float32)[:, None]
    div_term = jnp.exp(jnp.arange(0, D_MODEL, 2, dtype=jnp.float32)
                       * (-math.log(10000.0) / D_MODEL))
    pe = jnp.zeros((seq_len, D_MODEL), jnp.float32)
    pe = pe.at[:, 0::2].set(jnp.sin(position * div_term))
    pe = pe.at[:, 1::2].set(jnp.cos(position * div_term))
    return jnp.zeros((seq_len, D_PAD), jnp.float32).at[:, :D_MODEL].set(pe)


def init_params(key):
    """Deterministic synthetic parameters with PyTorch-equivalent shapes,
    pre-transposed to (in, out) at the TRUE (unpadded) dims."""
    ks = jax.random.split(key, 12)
    s = 0.02

    def lin(k, in_dim, out_dim):
        w = jax.random.normal(k, (out_dim, in_dim), jnp.float32) * s   # torch (out, in)
        return w.T, jnp.zeros((1, out_dim), jnp.float32)               # kernel (in, out)

    wq, bq = lin(ks[0], D_MODEL, D_MODEL)
    wk, bk = lin(ks[1], D_MODEL, D_MODEL)
    wv, bv = lin(ks[2], D_MODEL, D_MODEL)
    wo, bo = lin(ks[3], D_MODEL, D_MODEL)
    w1, b1 = lin(ks[4], D_MODEL, DIM_FF)
    w2, b2 = lin(ks[5], DIM_FF, D_MODEL)
    wp1, bp1 = lin(ks[6], D_MODEL, D_MODEL)
    wp2, bp2 = lin(ks[7], D_MODEL, NUM_CLASSES)

    ln1g = jnp.ones((1, D_MODEL), jnp.float32)
    ln1b = jnp.zeros((1, D_MODEL), jnp.float32)
    ln2g = jnp.ones((1, D_MODEL), jnp.float32)
    ln2b = jnp.zeros((1, D_MODEL), jnp.float32)

    return (wq, bq, wk, bk, wv, bv, wo, bo,
            ln1g, ln1b, w1, b1, w2, b2, ln2g, ln2b,
            wp1, bp1, wp2, bp2)


def pack_params(params, seq_len):
    """Pad everything to 128 lanes, split QKV/O per head, fold the softmax
    scale into Wq/bq, and pre-cast matmul weights to bf16 (done once)."""
    (wq, bq, wk, bk, wv, bv, wo, bo,
     ln1g, ln1b, w1, b1, w2, b2, ln2g, ln2b,
     wp1, bp1, wp2, bp2) = params

    scale = 1.0 / math.sqrt(HEAD_DIM)

    def per_head_in(w, b, fold_scale):
        if fold_scale:
            w = w * scale
            b = b * scale
        wh = jnp.zeros((NHEAD, D_PAD, HEAD_PAD), jnp.float32)
        bh = jnp.zeros((NHEAD, 1, HEAD_PAD), jnp.float32)
        for hi in range(NHEAD):
            sl = slice(hi * HEAD_DIM, (hi + 1) * HEAD_DIM)
            wh = wh.at[hi, :D_MODEL, :HEAD_DIM].set(w[:, sl])
            bh = bh.at[hi, 0, :HEAD_DIM].set(b[0, sl])
        return wh.astype(jnp.bfloat16), bh

    def per_head_out(w):
        wh = jnp.zeros((NHEAD, HEAD_PAD, D_PAD), jnp.float32)
        for hi in range(NHEAD):
            sl = slice(hi * HEAD_DIM, (hi + 1) * HEAD_DIM)
            wh = wh.at[hi, :HEAD_DIM, :D_MODEL].set(w[sl, :])
        return wh.astype(jnp.bfloat16)

    def pad2(a, shape, dtype=None):
        out = jnp.zeros(shape, jnp.float32).at[:a.shape[0], :a.shape[1]].set(a)
        return out.astype(dtype) if dtype is not None else out

    wq_h, bq_h = per_head_in(wq, bq, True)
    wk_h, bk_h = per_head_in(wk, bk, False)
    wv_h, bv_h = per_head_in(wv, bv, False)
    wo_h = per_head_out(wo)

    return (
        _make_pe_padded(seq_len),
        wq_h, bq_h, wk_h, bk_h, wv_h, bv_h, wo_h, pad2(bo, (1, D_PAD)),
        pad2(ln1g, (1, D_PAD)), pad2(ln1b, (1, D_PAD)),
        pad2(w1, (D_PAD, DIM_FF), jnp.bfloat16), pad2(b1, (1, DIM_FF)),
        pad2(w2, (DIM_FF, D_PAD), jnp.bfloat16), pad2(b2, (1, D_PAD)),
        pad2(ln2g, (1, D_PAD)), pad2(ln2b, (1, D_PAD)),
        pad2(wp1, (D_PAD, D_PAD), jnp.bfloat16), pad2(bp1, (1, D_PAD)),
        pad2(wp2, (D_PAD, OUT_PAD), jnp.bfloat16), pad2(bp2, (1, OUT_PAD)),
    )


def ciform_forward(x, packed):
    B, S, D = x.shape
    assert D == D_MODEL

    tile_b = B if B <= MAX_TILE_B else MAX_TILE_B
    n_tiles = pl.cdiv(B, tile_b)
    b_pad = n_tiles * tile_b

    # zero-pad: batch to a tile multiple, feature dim 80 -> 128 lanes
    x_p = jnp.zeros((b_pad, S, D_PAD), jnp.float32).at[:B, :, :D_MODEL].set(x)

    x_spec = pl.BlockSpec((tile_b, S, D_PAD), lambda b: (b, 0, 0))
    out_spec = pl.BlockSpec((tile_b, OUT_PAD), lambda b: (b, 0))
    # weights: full-array blocks that always map to block 0 -> stay resident in VMEM
    weight_specs = [pl.BlockSpec(a.shape, lambda b, n=a.ndim: (0,) * n) for a in packed]

    # right-size the scoped VMEM limit from the actual tile footprint
    weight_bytes = sum(int(a.size) * a.dtype.itemsize for a in packed)
    act_bytes = tile_b * S * (DIM_FF + 16 * D_PAD) * 4           # FFN intermediate + temporaries
    io_bytes = 2 * (tile_b * S * D_PAD + tile_b * OUT_PAD) * 4   # double-buffered x / out blocks
    vmem_limit = int(min(64 << 20, max(8 << 20, 2 * (weight_bytes + act_bytes + io_bytes))))

    out = pl.pallas_call(
        ciform_kernel,
        out_shape=jax.ShapeDtypeStruct((b_pad, OUT_PAD), jnp.float32),
        grid=(n_tiles,),
        in_specs=[x_spec] + weight_specs,
        out_specs=out_spec,
        compiler_params=pltpu.CompilerParams(
            dimension_semantics=("parallel",),
            vmem_limit_bytes=vmem_limit,
        ),
    )(x_p, *packed)

    return out[:B, :NUM_CLASSES]


if __name__ == "__main__":
    key = jax.random.PRNGKey(0)
    k_x, k_p = jax.random.split(key)

    B, S = 2, 8
    # mels: (batch, seq, d_model) as the PyTorch forward expects before permute
    x = jax.random.normal(k_x, (B, S, D_MODEL), jnp.float32)

    params = init_params(k_p)
    packed = pack_params(params, S)

    out = ciform_forward(x, packed)
    out = jax.block_until_ready(out)
    assert out.shape == (B, NUM_CLASSES)
    assert bool(jnp.all(jnp.isfinite(out)))
    print("KERNEL_OK")
</pallas_src>

<mosaic_0001>
module attributes {stable_mosaic.version = 11 : i64} {
  func.func @ciform_kernel(%arg0: i32, %arg1: memref<2x8x128xf32, #tpu.memory_space<vmem>>, %arg2: memref<8x128xf32, #tpu.memory_space<vmem>>, %arg3: memref<2x128x128xbf16, #tpu.memory_space<vmem>>, %arg4: memref<2x1x128xf32, #tpu.memory_space<vmem>>, %arg5: memref<2x128x128xbf16, #tpu.memory_space<vmem>>, %arg6: memref<2x1x128xf32, #tpu.memory_space<vmem>>, %arg7: memref<2x128x128xbf16, #tpu.memory_space<vmem>>, %arg8: memref<2x1x128xf32, #tpu.memory_space<vmem>>, %arg9: memref<2x128x128xbf16, #tpu.memory_space<vmem>>, %arg10: memref<1x128xf32, #tpu.memory_space<vmem>>, %arg11: memref<1x128xf32, #tpu.memory_space<vmem>>, %arg12: memref<1x128xf32, #tpu.memory_space<vmem>>, %arg13: memref<128x1024xbf16, #tpu.memory_space<vmem>>, %arg14: memref<1x1024xf32, #tpu.memory_space<vmem>>, %arg15: memref<1024x128xbf16, #tpu.memory_space<vmem>>, %arg16: memref<1x128xf32, #tpu.memory_space<vmem>>, %arg17: memref<1x128xf32, #tpu.memory_space<vmem>>, %arg18: memref<1x128xf32, #tpu.memory_space<vmem>>, %arg19: memref<128x128xbf16, #tpu.memory_space<vmem>>, %arg20: memref<1x128xf32, #tpu.memory_space<vmem>>, %arg21: memref<128x128xbf16, #tpu.memory_space<vmem>>, %arg22: memref<1x128xf32, #tpu.memory_space<vmem>>, %arg23: memref<2x128xf32, #tpu.memory_space<vmem>>) attributes {dimension_semantics = [#tpu.dimension_semantics<parallel>], iteration_bounds = array<i64: 1>, scalar_prefetch = 0 : i64, scratch_operands = 0 : i64, tpu.core_type = #tpu.core_type<tc>, window_params = [{transform_indices = @transform_0, window_bounds = array<i64: 2, 8, 128>}, {pipeline_mode = #tpu.pipeline_mode<synchronous>, transform_indices = @transform_1, window_bounds = array<i64: 8, 128>}, {pipeline_mode = #tpu.pipeline_mode<synchronous>, transform_indices = @transform_2, window_bounds = array<i64: 2, 128, 128>}, {pipeline_mode = #tpu.pipeline_mode<synchronous>, transform_indices = @transform_3, window_bounds = array<i64: 2, 1, 128>}, {pipeline_mode = #tpu.pipeline_mode<synchronous>, transform_indices = @transform_4, window_bounds = array<i64: 2, 128, 128>}, {pipeline_mode = #tpu.pipeline_mode<synchronous>, transform_indices = @transform_5, window_bounds = array<i64: 2, 1, 128>}, {pipeline_mode = #tpu.pipeline_mode<synchronous>, transform_indices = @transform_6, window_bounds = array<i64: 2, 128, 128>}, {pipeline_mode = #tpu.pipeline_mode<synchronous>, transform_indices = @transform_7, window_bounds = array<i64: 2, 1, 128>}, {pipeline_mode = #tpu.pipeline_mode<synchronous>, transform_indices = @transform_8, window_bounds = array<i64: 2, 128, 128>}, {pipeline_mode = #tpu.pipeline_mode<synchronous>, transform_indices = @transform_9, window_bounds = array<i64: 1, 128>}, {pipeline_mode = #tpu.pipeline_mode<synchronous>, transform_indices = @transform_10, window_bounds = array<i64: 1, 128>}, {pipeline_mode = #tpu.pipeline_mode<synchronous>, transform_indices = @transform_11, window_bounds = array<i64: 1, 128>}, {pipeline_mode = #tpu.pipeline_mode<synchronous>, transform_indices = @transform_12, window_bounds = array<i64: 128, 1024>}, {pipeline_mode = #tpu.pipeline_mode<synchronous>, transform_indices = @transform_13, window_bounds = array<i64: 1, 1024>}, {pipeline_mode = #tpu.pipeline_mode<synchronous>, transform_indices = @transform_14, window_bounds = array<i64: 1024, 128>}, {pipeline_mode = #tpu.pipeline_mode<synchronous>, transform_indices = @transform_15, window_bounds = array<i64: 1, 128>}, {pipeline_mode = #tpu.pipeline_mode<synchronous>, transform_indices = @transform_16, window_bounds = array<i64: 1, 128>}, {pipeline_mode = #tpu.pipeline_mode<synchronous>, transform_indices = @transform_17, window_bounds = array<i64: 1, 128>}, {pipeline_mode = #tpu.pipeline_mode<synchronous>, transform_indices = @transform_18, window_bounds = array<i64: 128, 128>}, {pipeline_mode = #tpu.pipeline_mode<synchronous>, transform_indices = @transform_19, window_bounds = array<i64: 1, 128>}, {pipeline_mode = #tpu.pipeline_mode<synchronous>, transform_indices = @transform_20, window_bounds = array<i64: 128, 128>}, {pipeline_mode = #tpu.pipeline_mode<synchronous>, transform_indices = @transform_21, window_bounds = array<i64: 1, 128>}, {transform_indices = @transform_22, window_bounds = array<i64: 2, 128>}]} {
    %c0 = arith.constant 0 : index
    %c0_0 = arith.constant 0 : index
    %c0_1 = arith.constant 0 : index
    %0 = vector.load %arg1[%c0, %c0_0, %c0_1] : memref<2x8x128xf32, #tpu.memory_space<vmem>>, vector<2x8x128xf32>
    %c0_2 = arith.constant 0 : index
    %c0_3 = arith.constant 0 : index
    %1 = vector.load %arg2[%c0_2, %c0_3] : memref<8x128xf32, #tpu.memory_space<vmem>>, vector<8x128xf32>
    %2 = vector.shape_cast %1 : vector<8x128xf32> to vector<1x8x128xf32>
    %3 = vector.broadcast %2 : vector<1x8x128xf32> to vector<2x8x128xf32>
    %4 = arith.addf %0, %3 : vector<2x8x128xf32>
    %5 = vector.shape_cast %4 : vector<2x8x128xf32> to vector<16x128xf32>
    %6 = arith.truncf %5 : vector<16x128xf32> to vector<16x128xbf16>
    %c0_4 = arith.constant 0 : index
    %c0_5 = arith.constant 0 : index
    %7 = vector.load %arg10[%c0_4, %c0_5] : memref<1x128xf32, #tpu.memory_space<vmem>>, vector<1x128xf32>
    %c0_6 = arith.constant 0 : index
    %c0_7 = arith.constant 0 : index
    %c0_8 = arith.constant 0 : index
    %8 = vector.load %arg3[%c0_6, %c0_7, %c0_8] : memref<2x128x128xbf16, #tpu.memory_space<vmem>>, vector<1x128x128xbf16>
    %9 = vector.shape_cast %8 : vector<1x128x128xbf16> to vector<128x128xbf16>
    %cst = arith.constant dense<0.000000e+00> : vector<16x128xf32>
    %10 = tpu.matmul %6, %9, %cst {dimension_numbers = #tpu.dot_dimension_numbers<[1], [0], [0], [1], [0, 0, 1, 1], [], []>} : vector<16x128xbf16>, vector<128x128xbf16>, vector<16x128xf32> -> vector<16x128xf32>
    %c0_9 = arith.constant 0 : index
    %c0_10 = arith.constant 0 : index
    %c0_11 = arith.constant 0 : index
    %11 = vector.load %arg4[%c0_9, %c0_10, %c0_11] : memref<2x1x128xf32, #tpu.memory_space<vmem>>, vector<1x1x128xf32>
    %12 = vector.shape_cast %11 : vector<1x1x128xf32> to vector<1x128xf32>
    %13 = vector.broadcast %12 : vector<1x128xf32> to vector<16x128xf32>
    %14 = arith.addf %10, %13 : vector<16x128xf32>
    %c0_12 = arith.constant 0 : index
    %c0_13 = arith.constant 0 : index
    %c0_14 = arith.constant 0 : index
    %15 = vector.load %arg5[%c0_12, %c0_13, %c0_14] : memref<2x128x128xbf16, #tpu.memory_space<vmem>>, vector<1x128x128xbf16>
    %16 = vector.shape_cast %15 : vector<1x128x128xbf16> to vector<128x128xbf16>
    %cst_15 = arith.constant dense<0.000000e+00> : vector<16x128xf32>
    %17 = tpu.matmul %6, %16, %cst_15 {dimension_numbers = #tpu.dot_dimension_numbers<[1], [0], [0], [1], [0, 0, 1, 1], [], []>} : vector<16x128xbf16>, vector<128x128xbf16>, vector<16x128xf32> -> vector<16x128xf32>
    %c0_16 = arith.constant 0 : index
    %c0_17 = arith.constant 0 : index
    %c0_18 = arith.constant 0 : index
    %18 = vector.load %arg6[%c0_16, %c0_17, %c0_18] : memref<2x1x128xf32, #tpu.memory_space<vmem>>, vector<1x1x128xf32>
    %19 = vector.shape_cast %18 : vector<1x1x128xf32> to vector<1x128xf32>
    %20 = vector.broadcast %19 : vector<1x128xf32> to vector<16x128xf32>
    %21 = arith.addf %17, %20 : vector<16x128xf32>
    %c0_19 = arith.constant 0 : index
    %c0_20 = arith.constant 0 : index
    %c0_21 = arith.constant 0 : index
    %22 = vector.load %arg7[%c0_19, %c0_20, %c0_21] : memref<2x128x128xbf16, #tpu.memory_space<vmem>>, vector<1x128x128xbf16>
    %23 = vector.shape_cast %22 : vector<1x128x128xbf16> to vector<128x128xbf16>
    %cst_22 = arith.constant dense<0.000000e+00> : vector<16x128xf32>
    %24 = tpu.matmul %6, %23, %cst_22 {dimension_numbers = #tpu.dot_dimension_numbers<[1], [0], [0], [1], [0, 0, 1, 1], [], []>} : vector<16x128xbf16>, vector<128x128xbf16>, vector<16x128xf32> -> vector<16x128xf32>
    %c0_23 = arith.constant 0 : index
    %c0_24 = arith.constant 0 : index
    %c0_25 = arith.constant 0 : index
    %25 = vector.load %arg8[%c0_23, %c0_24, %c0_25] : memref<2x1x128xf32, #tpu.memory_space<vmem>>, vector<1x1x128xf32>
    %26 = vector.shape_cast %25 : vector<1x1x128xf32> to vector<1x128xf32>
    %27 = vector.broadcast %26 : vector<1x128xf32> to vector<16x128xf32>
    %28 = arith.addf %24, %27 : vector<16x128xf32>
    %29 = vector.shape_cast %14 : vector<16x128xf32> to vector<2x8x128xf32>
    %30 = arith.truncf %29 : vector<2x8x128xf32> to vector<2x8x128xbf16>
    %31 = vector.shape_cast %21 : vector<16x128xf32> to vector<2x8x128xf32>
    %32 = arith.truncf %31 : vector<2x8x128xf32> to vector<2x8x128xbf16>
    %33 = vector.shape_cast %28 : vector<16x128xf32> to vector<2x8x128xf32>
    %34 = arith.truncf %33 : vector<2x8x128xf32> to vector<2x8x128xbf16>
    "tpu.trace_start"() <{level = 10 : i32, message = "bqd,bkd->bqk"}> : () -> ()
    %cst_26 = arith.constant dense<0.000000e+00> : vector<2x8x8xf32>
    %35 = tpu.matmul %30, %32, %cst_26 {dimension_numbers = #tpu.dot_dimension_numbers<[2], [2], [1], [1], [0, 0, 0, 1, 1, 1], [0], [0]>} : vector<2x8x128xbf16>, vector<2x8x128xbf16>, vector<2x8x8xf32> -> vector<2x8x8xf32>
    "tpu.trace_stop"() : () -> ()
    %cst_27 = arith.constant dense<0xFF800000> : vector<2x8xf32>
    %36 = vector.multi_reduction <maximumf>, %35, %cst_27 [2] : vector<2x8x8xf32> to vector<2x8xf32>
    %37 = vector.shape_cast %36 : vector<2x8xf32> to vector<2x8x1xf32>
    %38 = vector.broadcast %37 : vector<2x8x1xf32> to vector<2x8x8xf32>
    %39 = arith.subf %35, %38 : vector<2x8x8xf32>
    %40 = math.exp %39 : vector<2x8x8xf32>
    %cst_28 = arith.constant dense<0.000000e+00> : vector<2x8xf32>
    %41 = vector.multi_reduction <add>, %40, %cst_28 [2] : vector<2x8x8xf32> to vector<2x8xf32>
    %42 = vector.shape_cast %41 : vector<2x8xf32> to vector<2x8x1xf32>
    %43 = tpu.reciprocal %42 {approx = true} : vector<2x8x1xf32> -> vector<2x8x1xf32>
    %44 = vector.broadcast %43 : vector<2x8x1xf32> to vector<2x8x8xf32>
    %45 = arith.mulf %40, %44 : vector<2x8x8xf32>
    %46 = arith.truncf %45 : vector<2x8x8xf32> to vector<2x8x8xbf16>
    "tpu.trace_start"() <{level = 10 : i32, message = "bqk,bkd->bqd"}> : () -> ()
    %cst_29 = arith.constant dense<0.000000e+00> : vector<2x8x128xf32>
    %47 = tpu.matmul %46, %34, %cst_29 {dimension_numbers = #tpu.dot_dimension_numbers<[2], [1], [1], [2], [0, 0, 0, 1, 1, 2], [0], [0]>} : vector<2x8x8xbf16>, vector<2x8x128xbf16>, vector<2x8x128xf32> -> vector<2x8x128xf32>
    "tpu.trace_stop"() : () -> ()
    %48 = vector.shape_cast %47 : vector<2x8x128xf32> to vector<16x128xf32>
    %49 = arith.truncf %48 : vector<16x128xf32> to vector<16x128xbf16>
    %c0_30 = arith.constant 0 : index
    %c0_31 = arith.constant 0 : index
    %c0_32 = arith.constant 0 : index
    %50 = vector.load %arg9[%c0_30, %c0_31, %c0_32] : memref<2x128x128xbf16, #tpu.memory_space<vmem>>, vector<1x128x128xbf16>
    %51 = vector.shape_cast %50 : vector<1x128x128xbf16> to vector<128x128xbf16>
    %cst_33 = arith.constant dense<0.000000e+00> : vector<16x128xf32>
    %52 = tpu.matmul %49, %51, %cst_33 {dimension_numbers = #tpu.dot_dimension_numbers<[1], [0], [0], [1], [0, 0, 1, 1], [], []>} : vector<16x128xbf16>, vector<128x128xbf16>, vector<16x128xf32> -> vector<16x128xf32>
    %53 = vector.broadcast %7 : vector<1x128xf32> to vector<16x128xf32>
    %54 = arith.addf %53, %52 : vector<16x128xf32>
    %c1 = arith.constant 1 : index
    %c0_34 = arith.constant 0 : index
    %c0_35 = arith.constant 0 : index
    %55 = vector.load %arg3[%c1, %c0_34, %c0_35] : memref<2x128x128xbf16, #tpu.memory_space<vmem>>, vector<1x128x128xbf16>
    %56 = vector.shape_cast %55 : vector<1x128x128xbf16> to vector<128x128xbf16>
    %cst_36 = arith.constant dense<0.000000e+00> : vector<16x128xf32>
    %57 = tpu.matmul %6, %56, %cst_36 {dimension_numbers = #tpu.dot_dimension_numbers<[1], [0], [0], [1], [0, 0, 1, 1], [], []>} : vector<16x128xbf16>, vector<128x128xbf16>, vector<16x128xf32> -> vector<16x128xf32>
    %c1_37 = arith.constant 1 : index
    %c0_38 = arith.constant 0 : index
    %c0_39 = arith.constant 0 : index
    %58 = vector.load %arg4[%c1_37, %c0_38, %c0_39] : memref<2x1x128xf32, #tpu.memory_space<vmem>>, vector<1x1x128xf32>
    %59 = vector.shape_cast %58 : vector<1x1x128xf32> to vector<1x128xf32>
    %60 = vector.broadcast %59 : vector<1x128xf32> to vector<16x128xf32>
    %61 = arith.addf %57, %60 : vector<16x128xf32>
    %c1_40 = arith.constant 1 : index
    %c0_41 = arith.constant 0 : index
    %c0_42 = arith.constant 0 : index
    %62 = vector.load %arg5[%c1_40, %c0_41, %c0_42] : memref<2x128x128xbf16, #tpu.memory_space<vmem>>, vector<1x128x128xbf16>
    %63 = vector.shape_cast %62 : vector<1x128x128xbf16> to vector<128x128xbf16>
    %cst_43 = arith.constant dense<0.000000e+00> : vector<16x128xf32>
    %64 = tpu.matmul %6, %63, %cst_43 {dimension_numbers = #tpu.dot_dimension_numbers<[1], [0], [0], [1], [0, 0, 1, 1], [], []>} : vector<16x128xbf16>, vector<128x128xbf16>, vector<16x128xf32> -> vector<16x128xf32>
    %c1_44 = arith.constant 1 : index
    %c0_45 = arith.constant 0 : index
    %c0_46 = arith.constant 0 : index
    %65 = vector.load %arg6[%c1_44, %c0_45, %c0_46] : memref<2x1x128xf32, #tpu.memory_space<vmem>>, vector<1x1x128xf32>
    %66 = vector.shape_cast %65 : vector<1x1x128xf32> to vector<1x128xf32>
    %67 = vector.broadcast %66 : vector<1x128xf32> to vector<16x128xf32>
    %68 = arith.addf %64, %67 : vector<16x128xf32>
    %c1_47 = arith.constant 1 : index
    %c0_48 = arith.constant 0 : index
    %c0_49 = arith.constant 0 : index
    %69 = vector.load %arg7[%c1_47, %c0_48, %c0_49] : memref<2x128x128xbf16, #tpu.memory_space<vmem>>, vector<1x128x128xbf16>
    %70 = vector.shape_cast %69 : vector<1x128x128xbf16> to vector<128x128xbf16>
    %cst_50 = arith.constant dense<0.000000e+00> : vector<16x128xf32>
    %71 = tpu.matmul %6, %70, %cst_50 {dimension_numbers = #tpu.dot_dimension_numbers<[1], [0], [0], [1], [0, 0, 1, 1], [], []>} : vector<16x128xbf16>, vector<128x128xbf16>, vector<16x128xf32> -> vector<16x128xf32>
    %c1_51 = arith.constant 1 : index
    %c0_52 = arith.constant 0 : index
    %c0_53 = arith.constant 0 : index
    %72 = vector.load %arg8[%c1_51, %c0_52, %c0_53] : memref<2x1x128xf32, #tpu.memory_space<vmem>>, vector<1x1x128xf32>
    %73 = vector.shape_cast %72 : vector<1x1x128xf32> to vector<1x128xf32>
    %74 = vector.broadcast %73 : vector<1x128xf32> to vector<16x128xf32>
    %75 = arith.addf %71, %74 : vector<16x128xf32>
    %76 = vector.shape_cast %61 : vector<16x128xf32> to vector<2x8x128xf32>
    %77 = arith.truncf %76 : vector<2x8x128xf32> to vector<2x8x128xbf16>
    %78 = vector.shape_cast %68 : vector<16x128xf32> to vector<2x8x128xf32>
    %79 = arith.truncf %78 : vector<2x8x128xf32> to vector<2x8x128xbf16>
    %80 = vector.shape_cast %75 : vector<16x128xf32> to vector<2x8x128xf32>
    %81 = arith.truncf %80 : vector<2x8x128xf32> to vector<2x8x128xbf16>
    "tpu.trace_start"() <{level = 10 : i32, message = "bqd,bkd->bqk"}> : () -> ()
    %cst_54 = arith.constant dense<0.000000e+00> : vector<2x8x8xf32>
    %82 = tpu.matmul %77, %79, %cst_54 {dimension_numbers = #tpu.dot_dimension_numbers<[2], [2], [1], [1], [0, 0, 0, 1, 1, 1], [0], [0]>} : vector<2x8x128xbf16>, vector<2x8x128xbf16>, vector<2x8x8xf32> -> vector<2x8x8xf32>
    "tpu.trace_stop"() : () -> ()
    %cst_55 = arith.constant dense<0xFF800000> : vector<2x8xf32>
    %83 = vector.multi_reduction <maximumf>, %82, %cst_55 [2] : vector<2x8x8xf32> to vector<2x8xf32>
    %84 = vector.shape_cast %83 : vector<2x8xf32> to vector<2x8x1xf32>
    %85 = vector.broadcast %84 : vector<2x8x1xf32> to vector<2x8x8xf32>
    %86 = arith.subf %82, %85 : vector<2x8x8xf32>
    %87 = math.exp %86 : vector<2x8x8xf32>
    %cst_56 = arith.constant dense<0.000000e+00> : vector<2x8xf32>
    %88 = vector.multi_reduction <add>, %87, %cst_56 [2] : vector<2x8x8xf32> to vector<2x8xf32>
    %89 = vector.shape_cast %88 : vector<2x8xf32> to vector<2x8x1xf32>
    %90 = tpu.reciprocal %89 {approx = true} : vector<2x8x1xf32> -> vector<2x8x1xf32>
    %91 = vector.broadcast %90 : vector<2x8x1xf32> to vector<2x8x8xf32>
    %92 = arith.mulf %87, %91 : vector<2x8x8xf32>
    %93 = arith.truncf %92 : vector<2x8x8xf32> to vector<2x8x8xbf16>
    "tpu.trace_start"() <{level = 10 : i32, message = "bqk,bkd->bqd"}> : () -> ()
    %cst_57 = arith.constant dense<0.000000e+00> : vector<2x8x128xf32>
    %94 = tpu.matmul %93, %81, %cst_57 {dimension_numbers = #tpu.dot_dimension_numbers<[2], [1], [1], [2], [0, 0, 0, 1, 1, 2], [0], [0]>} : vector<2x8x8xbf16>, vector<2x8x128xbf16>, vector<2x8x128xf32> -> vector<2x8x128xf32>
    "tpu.trace_stop"() : () -> ()
    %95 = vector.shape_cast %94 : vector<2x8x128xf32> to vector<16x128xf32>
    %96 = arith.truncf %95 : vector<16x128xf32> to vector<16x128xbf16>
    %c1_58 = arith.constant 1 : index
    %c0_59 = arith.constant 0 : index
    %c0_60 = arith.constant 0 : index
    %97 = vector.load %arg9[%c1_58, %c0_59, %c0_60] : memref<2x128x128xbf16, #tpu.memory_space<vmem>>, vector<1x128x128xbf16>
    %98 = vector.shape_cast %97 : vector<1x128x128xbf16> to vector<128x128xbf16>
    %cst_61 = arith.constant dense<0.000000e+00> : vector<16x128xf32>
    %99 = tpu.matmul %96, %98, %cst_61 {dimension_numbers = #tpu.dot_dimension_numbers<[1], [0], [0], [1], [0, 0, 1, 1], [], []>} : vector<16x128xbf16>, vector<128x128xbf16>, vector<16x128xf32> -> vector<16x128xf32>
    %100 = arith.addf %54, %99 : vector<16x128xf32>
    %101 = arith.addf %5, %100 : vector<16x128xf32>
    %c0_62 = arith.constant 0 : index
    %c0_63 = arith.constant 0 : index
    %102 = vector.load %arg11[%c0_62, %c0_63] : memref<1x128xf32, #tpu.memory_space<vmem>>, vector<1x128xf32>
    %c0_64 = arith.constant 0 : index
    %c0_65 = arith.constant 0 : index
    %103 = vector.load %arg12[%c0_64, %c0_65] : memref<1x128xf32, #tpu.memory_space<vmem>>, vector<1x128xf32>
    %cst_66 = arith.constant dense<0.000000e+00> : vector<16xf32>
    %104 = vector.multi_reduction <add>, %101, %cst_66 [1] : vector<16x128xf32> to vector<16xf32>
    %105 = vector.shape_cast %104 : vector<16xf32> to vector<16x1xf32>
    %cst_67 = arith.constant 1.250000e-02 : f32
    %106 = vector.broadcast %cst_67 : f32 to vector<16x1xf32>
    %107 = arith.mulf %105, %106 : vector<16x1xf32>
    %108 = arith.mulf %101, %101 : vector<16x128xf32>
    %cst_68 = arith.constant dense<0.000000e+00> : vector<16xf32>
    %109 = vector.multi_reduction <add>, %108, %cst_68 [1] : vector<16x128xf32> to vector<16xf32>
    %110 = vector.shape_cast %109 : vector<16xf32> to vector<16x1xf32>
    %cst_69 = arith.constant 1.250000e-02 : f32
    %111 = vector.broadcast %cst_69 : f32 to vector<16x1xf32>
    %112 = arith.mulf %110, %111 : vector<16x1xf32>
    %113 = arith.mulf %107, %107 : vector<16x1xf32>
    %114 = arith.subf %112, %113 : vector<16x1xf32>
    %115 = vector.broadcast %107 : vector<16x1xf32> to vector<16x128xf32>
    %116 = arith.subf %101, %115 : vector<16x128xf32>
    %cst_70 = arith.constant 9.99999974E-6 : f32
    %117 = vector.broadcast %cst_70 : f32 to vector<16x1xf32>
    %118 = arith.addf %114, %117 : vector<16x1xf32>
    %119 = math.rsqrt %118 : vector<16x1xf32>
    %120 = vector.broadcast %119 : vector<16x1xf32> to vector<16x128xf32>
    %121 = arith.mulf %116, %120 : vector<16x128xf32>
    %122 = vector.broadcast %102 : vector<1x128xf32> to vector<16x128xf32>
    %123 = arith.mulf %121, %122 : vector<16x128xf32>
    %124 = vector.broadcast %103 : vector<1x128xf32> to vector<16x128xf32>
    %125 = arith.addf %123, %124 : vector<16x128xf32>
    %126 = arith.truncf %125 : vector<16x128xf32> to vector<16x128xbf16>
    %c0_71 = arith.constant 0 : index
    %c0_72 = arith.constant 0 : index
    %127 = vector.load %arg13[%c0_71, %c0_72] : memref<128x1024xbf16, #tpu.memory_space<vmem>>, vector<128x1024xbf16>
    %cst_73 = arith.constant dense<0.000000e+00> : vector<16x1024xf32>
    %128 = tpu.matmul %126, %127, %cst_73 {dimension_numbers = #tpu.dot_dimension_numbers<[1], [0], [0], [1], [0, 0, 1, 1], [], []>} : vector<16x128xbf16>, vector<128x1024xbf16>, vector<16x1024xf32> -> vector<16x1024xf32>
    %c0_74 = arith.constant 0 : index
    %c0_75 = arith.constant 0 : index
    %129 = vector.load %arg14[%c0_74, %c0_75] : memref<1x1024xf32, #tpu.memory_space<vmem>>, vector<1x1024xf32>
    %130 = vector.broadcast %129 : vector<1x1024xf32> to vector<16x1024xf32>
    %131 = arith.addf %128, %130 : vector<16x1024xf32>
    %cst_76 = arith.constant 0.000000e+00 : f32
    %132 = vector.broadcast %cst_76 : f32 to vector<16x1024xf32>
    %133 = arith.maximumf %131, %132 : vector<16x1024xf32>
    %134 = arith.truncf %133 : vector<16x1024xf32> to vector<16x1024xbf16>
    %c0_77 = arith.constant 0 : index
    %c0_78 = arith.constant 0 : index
    %135 = vector.load %arg15[%c0_77, %c0_78] : memref<1024x128xbf16, #tpu.memory_space<vmem>>, vector<1024x128xbf16>
    %cst_79 = arith.constant dense<0.000000e+00> : vector<16x128xf32>
    %136 = tpu.matmul %134, %135, %cst_79 {dimension_numbers = #tpu.dot_dimension_numbers<[1], [0], [0], [1], [0, 0, 1, 1], [], []>} : vector<16x1024xbf16>, vector<1024x128xbf16>, vector<16x128xf32> -> vector<16x128xf32>
    %c0_80 = arith.constant 0 : index
    %c0_81 = arith.constant 0 : index
    %137 = vector.load %arg16[%c0_80, %c0_81] : memref<1x128xf32, #tpu.memory_space<vmem>>, vector<1x128xf32>
    %138 = vector.broadcast %137 : vector<1x128xf32> to vector<16x128xf32>
    %139 = arith.addf %136, %138 : vector<16x128xf32>
    %140 = arith.addf %125, %139 : vector<16x128xf32>
    %c0_82 = arith.constant 0 : index
    %c0_83 = arith.constant 0 : index
    %141 = vector.load %arg17[%c0_82, %c0_83] : memref<1x128xf32, #tpu.memory_space<vmem>>, vector<1x128xf32>
    %c0_84 = arith.constant 0 : index
    %c0_85 = arith.constant 0 : index
    %142 = vector.load %arg18[%c0_84, %c0_85] : memref<1x128xf32, #tpu.memory_space<vmem>>, vector<1x128xf32>
    %cst_86 = arith.constant dense<0.000000e+00> : vector<16xf32>
    %143 = vector.multi_reduction <add>, %140, %cst_86 [1] : vector<16x128xf32> to vector<16xf32>
    %144 = vector.shape_cast %143 : vector<16xf32> to vector<16x1xf32>
    %cst_87 = arith.constant 1.250000e-02 : f32
    %145 = vector.broadcast %cst_87 : f32 to vector<16x1xf32>
    %146 = arith.mulf %144, %145 : vector<16x1xf32>
    %147 = arith.mulf %140, %140 : vector<16x128xf32>
    %cst_88 = arith.constant dense<0.000000e+00> : vector<16xf32>
    %148 = vector.multi_reduction <add>, %147, %cst_88 [1] : vector<16x128xf32> to vector<16xf32>
    %149 = vector.shape_cast %148 : vector<16xf32> to vector<16x1xf32>
    %cst_89 = arith.constant 1.250000e-02 : f32
    %150 = vector.broadcast %cst_89 : f32 to vector<16x1xf32>
    %151 = arith.mulf %149, %150 : vector<16x1xf32>
    %152 = arith.mulf %146, %146 : vector<16x1xf32>
    %153 = arith.subf %151, %152 : vector<16x1xf32>
    %154 = vector.broadcast %146 : vector<16x1xf32> to vector<16x128xf32>
    %155 = arith.subf %140, %154 : vector<16x128xf32>
    %cst_90 = arith.constant 9.99999974E-6 : f32
    %156 = vector.broadcast %cst_90 : f32 to vector<16x1xf32>
    %157 = arith.addf %153, %156 : vector<16x1xf32>
    %158 = math.rsqrt %157 : vector<16x1xf32>
    %159 = vector.broadcast %158 : vector<16x1xf32> to vector<16x128xf32>
    %160 = arith.mulf %155, %159 : vector<16x128xf32>
    %161 = vector.broadcast %141 : vector<1x128xf32> to vector<16x128xf32>
    %162 = arith.mulf %160, %161 : vector<16x128xf32>
    %163 = vector.broadcast %142 : vector<1x128xf32> to vector<16x128xf32>
    %164 = arith.addf %162, %163 : vector<16x128xf32>
    %165 = vector.shape_cast %164 : vector<16x128xf32> to vector<2x8x128xf32>
    %cst_91 = arith.constant dense<0.000000e+00> : vector<2x128xf32>
    %166 = vector.multi_reduction <add>, %165, %cst_91 [1] : vector<2x8x128xf32> to vector<2x128xf32>
    %cst_92 = arith.constant 1.250000e-01 : f32
    %167 = vector.broadcast %cst_92 : f32 to vector<2x128xf32>
    %168 = arith.mulf %166, %167 : vector<2x128xf32>
    %169 = arith.truncf %168 : vector<2x128xf32> to vector<2x128xbf16>
    %c0_93 = arith.constant 0 : index
    %c0_94 = arith.constant 0 : index
    %170 = vector.load %arg19[%c0_93, %c0_94] : memref<128x128xbf16, #tpu.memory_space<vmem>>, vector<128x128xbf16>
    %cst_95 = arith.constant dense<0.000000e+00> : vector<2x128xf32>
    %171 = tpu.matmul %169, %170, %cst_95 {dimension_numbers = #tpu.dot_dimension_numbers<[1], [0], [0], [1], [0, 0, 1, 1], [], []>} : vector<2x128xbf16>, vector<128x128xbf16>, vector<2x128xf32> -> vector<2x128xf32>
    %c0_96 = arith.constant 0 : index
    %c0_97 = arith.constant 0 : index
    %172 = vector.load %arg20[%c0_96, %c0_97] : memref<1x128xf32, #tpu.memory_space<vmem>>, vector<1x128xf32>
    %173 = vector.broadcast %172 : vector<1x128xf32> to vector<2x128xf32>
    %174 = arith.addf %171, %173 : vector<2x128xf32>
    %cst_98 = arith.constant 0.000000e+00 : f32
    %175 = vector.broadcast %cst_98 : f32 to vector<2x128xf32>
    %176 = arith.maximumf %174, %175 : vector<2x128xf32>
    %177 = arith.truncf %176 : vector<2x128xf32> to vector<2x128xbf16>
    %c0_99 = arith.constant 0 : index
    %c0_100 = arith.constant 0 : index
    %178 = vector.load %arg21[%c0_99, %c0_100] : memref<128x128xbf16, #tpu.memory_space<vmem>>, vector<128x128xbf16>
    %cst_101 = arith.constant dense<0.000000e+00> : vector<2x128xf32>
    %179 = tpu.matmul %177, %178, %cst_101 {dimension_numbers = #tpu.dot_dimension_numbers<[1], [0], [0], [1], [0, 0, 1, 1], [], []>} : vector<2x128xbf16>, vector<128x128xbf16>, vector<2x128xf32> -> vector<2x128xf32>
    %c0_102 = arith.constant 0 : index
    %c0_103 = arith.constant 0 : index
    %180 = vector.load %arg22[%c0_102, %c0_103] : memref<1x128xf32, #tpu.memory_space<vmem>>, vector<1x128xf32>
    %181 = vector.broadcast %180 : vector<1x128xf32> to vector<2x128xf32>
    %182 = arith.addf %179, %181 : vector<2x128xf32>
    %c0_104 = arith.constant 0 : index
    %c0_105 = arith.constant 0 : index
    %183 = vector.load %arg23[%c0_104, %c0_105] : memref<2x128xf32, #tpu.memory_space<vmem>>, vector<2x128xf32>
    tpu.vector_store %arg23[%c0_104, %c0_105], %182 {strides = array<i32>} : memref<2x128xf32, #tpu.memory_space<vmem>>, vector<2x128xf32>,
    return
  }
  func.func @transform_0(%arg0: i32) -> (i32, i32, i32) {
    %c0_i32 = arith.constant 0 : i32
    %c0_i32_0 = arith.constant 0 : i32
    %c0_i32_1 = arith.constant 0 : i32
    return %arg0, %c0_i32, %c0_i32_0 : i32, i32, i32
  }
  func.func @transform_1(%arg0: i32) -> (i32, i32) {
    %c0_i32 = arith.constant 0 : i32
    %c0_i32_0 = arith.constant 0 : i32
    %c0_i32_1 = arith.constant 0 : i32
    return %c0_i32, %c0_i32_0 : i32, i32
  }
  func.func @transform_2(%arg0: i32) -> (i32, i32, i32) {
    %c0_i32 = arith.constant 0 : i32
    %c0_i32_0 = arith.constant 0 : i32
    %c0_i32_1 = arith.constant 0 : i32
    %c0_i32_2 = arith.constant 0 : i32
    return %c0_i32, %c0_i32_0, %c0_i32_1 : i32, i32, i32
  }
  func.func @transform_3(%arg0: i32) -> (i32, i32, i32) {
    %c0_i32 = arith.constant 0 : i32
    %c0_i32_0 = arith.constant 0 : i32
    %c0_i32_1 = arith.constant 0 : i32
    %c0_i32_2 = arith.constant 0 : i32
    return %c0_i32, %c0_i32_0, %c0_i32_1 : i32, i32, i32
  }
  func.func @transform_4(%arg0: i32) -> (i32, i32, i32) {
    %c0_i32 = arith.constant 0 : i32
    %c0_i32_0 = arith.constant 0 : i32
    %c0_i32_1 = arith.constant 0 : i32
    %c0_i32_2 = arith.constant 0 : i32
    return %c0_i32, %c0_i32_0, %c0_i32_1 : i32, i32, i32
  }
  func.func @transform_5(%arg0: i32) -> (i32, i32, i32) {
    %c0_i32 = arith.constant 0 : i32
    %c0_i32_0 = arith.constant 0 : i32
    %c0_i32_1 = arith.constant 0 : i32
    %c0_i32_2 = arith.constant 0 : i32
    return %c0_i32, %c0_i32_0, %c0_i32_1 : i32, i32, i32
  }
  func.func @transform_6(%arg0: i32) -> (i32, i32, i32) {
    %c0_i32 = arith.constant 0 : i32
    %c0_i32_0 = arith.constant 0 : i32
    %c0_i32_1 = arith.constant 0 : i32
    %c0_i32_2 = arith.constant 0 : i32
    return %c0_i32, %c0_i32_0, %c0_i32_1 : i32, i32, i32
  }
  func.func @transform_7(%arg0: i32) -> (i32, i32, i32) {
    %c0_i32 = arith.constant 0 : i32
    %c0_i32_0 = arith.constant 0 : i32
    %c0_i32_1 = arith.constant 0 : i32
    %c0_i32_2 = arith.constant 0 : i32
    return %c0_i32, %c0_i32_0, %c0_i32_1 : i32, i32, i32
  }
  func.func @transform_8(%arg0: i32) -> (i32, i32, i32) {
    %c0_i32 = arith.constant 0 : i32
    %c0_i32_0 = arith.constant 0 : i32
    %c0_i32_1 = arith.constant 0 : i32
    %c0_i32_2 = arith.constant 0 : i32
    return %c0_i32, %c0_i32_0, %c0_i32_1 : i32, i32, i32
  }
  func.func @transform_9(%arg0: i32) -> (i32, i32) {
    %c0_i32 = arith.constant 0 : i32
    %c0_i32_0 = arith.constant 0 : i32
    %c0_i32_1 = arith.constant 0 : i32
    return %c0_i32, %c0_i32_0 : i32, i32
  }
  func.func @transform_10(%arg0: i32) -> (i32, i32) {
    %c0_i32 = arith.constant 0 : i32
    %c0_i32_0 = arith.constant 0 : i32
    %c0_i32_1 = arith.constant 0 : i32
    return %c0_i32, %c0_i32_0 : i32, i32
  }
  func.func @transform_11(%arg0: i32) -> (i32, i32) {
    %c0_i32 = arith.constant 0 : i32
    %c0_i32_0 = arith.constant 0 : i32
    %c0_i32_1 = arith.constant 0 : i32
    return %c0_i32, %c0_i32_0 : i32, i32
  }
  func.func @transform_12(%arg0: i32) -> (i32, i32) {
    %c0_i32 = arith.constant 0 : i32
    %c0_i32_0 = arith.constant 0 : i32
    %c0_i32_1 = arith.constant 0 : i32
    return %c0_i32, %c0_i32_0 : i32, i32
  }
  func.func @transform_13(%arg0: i32) -> (i32, i32) {
    %c0_i32 = arith.constant 0 : i32
    %c0_i32_0 = arith.constant 0 : i32
    %c0_i32_1 = arith.constant 0 : i32
    return %c0_i32, %c0_i32_0 : i32, i32
  }
  func.func @transform_14(%arg0: i32) -> (i32, i32) {
    %c0_i32 = arith.constant 0 : i32
    %c0_i32_0 = arith.constant 0 : i32
    %c0_i32_1 = arith.constant 0 : i32
    return %c0_i32, %c0_i32_0 : i32, i32
  }
  func.func @transform_15(%arg0: i32) -> (i32, i32) {
    %c0_i32 = arith.constant 0 : i32
    %c0_i32_0 = arith.constant 0 : i32
    %c0_i32_1 = arith.constant 0 : i32
    return %c0_i32, %c0_i32_0 : i32, i32
  }
  func.func @transform_16(%arg0: i32) -> (i32, i32) {
    %c0_i32 = arith.constant 0 : i32
    %c0_i32_0 = arith.constant 0 : i32
    %c0_i32_1 = arith.constant 0 : i32
    return %c0_i32, %c0_i32_0 : i32, i32
  }
  func.func @transform_17(%arg0: i32) -> (i32, i32) {
    %c0_i32 = arith.constant 0 : i32
    %c0_i32_0 = arith.constant 0 : i32
    %c0_i32_1 = arith.constant 0 : i32
    return %c0_i32, %c0_i32_0 : i32, i32
  }
  func.func @transform_18(%arg0: i32) -> (i32, i32) {
    %c0_i32 = arith.constant 0 : i32
    %c0_i32_0 = arith.constant 0 : i32
    %c0_i32_1 = arith.constant 0 : i32
    return %c0_i32, %c0_i32_0 : i32, i32
  }
  func.func @transform_19(%arg0: i32) -> (i32, i32) {
    %c0_i32 = arith.constant 0 : i32
    %c0_i32_0 = arith.constant 0 : i32
    %c0_i32_1 = arith.constant 0 : i32
    return %c0_i32, %c0_i32_0 : i32, i32
  }
  func.func @transform_20(%arg0: i32) -> (i32, i32) {
    %c0_i32 = arith.constant 0 : i32
    %c0_i32_0 = arith.constant 0 : i32
    %c0_i32_1 = arith.constant 0 : i32
    return %c0_i32, %c0_i32_0 : i32, i32
  }
  func.func @transform_21(%arg0: i32) -> (i32, i32) {
    %c0_i32 = arith.constant 0 : i32
    %c0_i32_0 = arith.constant 0 : i32
    %c0_i32_1 = arith.constant 0 : i32
    return %c0_i32, %c0_i32_0 : i32, i32
  }
  func.func @transform_22(%arg0: i32) -> (i32, i32) {
    %c0_i32 = arith.constant 0 : i32
    %c0_i32_0 = arith.constant 0 : i32
    return %arg0, %c0_i32 : i32, i32
  }
}

</mosaic_0001>

<bundles_post_ra>
// kernel: tpu_custom_call.1
= control target key start
LH: loop header
LB: loop body
LE: loop exit
PB: predicated region body
PF: predicated region fallthrough
CT: control target
= control target key end

     0   :  { %s5217_s0 = inlined_call_operand.hbm [shape: f32[2,8,128], index: 0, kind: input, shape index: {}]   ;;  %s5218_s1 = inlined_call_operand.hbm [shape: f32[8,128], index: 1, kind: input, shape index: {}]   ;;  %s5219_s2 = inlined_call_operand.hbm [shape: bf16[2,128,128], index: 2, kind: input, shape index: {}]   ;;  %s5220_s3 = inlined_call_operand.vmem [shape: f32[2,1,128], index: 3, kind: input, shape index: {}]   ;;  %s5221_s4 = inlined_call_operand.hbm [shape: bf16[2,128,128], index: 4, kind: input, shape index: {}]   ;;  %s5222_s5 = inlined_call_operand.vmem [shape: f32[2,1,128], index: 5, kind: input, shape index: {}]   ;;  %s5223_s6 = inlined_call_operand.hbm [shape: bf16[2,128,128], index: 6, kind: input, shape index: {}]   ;;  %s5224_s7 = inlined_call_operand.hbm [shape: f32[2,1,128], index: 7, kind: input, shape index: {}]   ;;  %s5225_s8 = inlined_call_operand.hbm [shape: bf16[2,128,128], index: 8, kind: input, shape index: {}]   ;;  %s5226_s9 = inlined_call_operand.hbm [shape: f32[1,128], index: 9, kind: input, shape index: {}]   ;;  %s5227_s10 = inlined_call_operand.hbm [shape: f32[1,128], index: 10, kind: input, shape index: {}]   ;;  %s5228_s11 = inlined_call_operand.hbm [shape: f32[1,128], index: 11, kind: input, shape index: {}]   ;;  %s5229_s12 = inlined_call_operand.hbm [shape: bf16[128,1024], index: 12, kind: input, shape index: {}]   ;;  %s5230_s13 = inlined_call_operand.hbm [shape: f32[1,1024], index: 13, kind: input, shape index: {}]   ;;  %s5231_s14 = inlined_call_operand.hbm [shape: bf16[1024,128], index: 14, kind: input, shape index: {}]   ;;  %s5232_s15 = inlined_call_operand.hbm [shape: f32[1,128], index: 15, kind: input, shape index: {}]   ;;  %s5233_s16 = inlined_call_operand.hbm [shape: f32[1,128], index: 16, kind: input, shape index: {}]   ;;  %s5234_s17 = inlined_call_operand.hbm [shape: f32[1,128], index: 17, kind: input, shape index: {}]   ;;  %s5235_s18 = inlined_call_operand.vmem [shape: bf16[128,128], index: 18, kind: input, shape index: {}]   ;;  %s5236_s19 = inlined_call_operand.vmem [shape: f32[1,128], index: 19, kind: input, shape index: {}]   ;;  %s5237_s20 = inlined_call_operand.hbm [shape: bf16[128,128], index: 20, kind: input, shape index: {}]   ;;  %s5238_s21 = inlined_call_operand.vmem [shape: f32[1,128], index: 21, kind: input, shape index: {}]   ;;  %s5239_s22 = inlined_call_operand.hbm [shape: f32[2,128], index: 22, kind: output, shape index: {}]  }
   0x1   :  { %5252 = sst [smem:[#allocation40_spill]] %s5217_s0 }
   0x2   :  { %5253 = sst [smem:[#allocation41_spill]] %s5218_s1 }
   0x3   :  { %5254 = sst [smem:[#allocation42_spill]] %s5219_s2 }
   0x4   :  { %5255 = sst [smem:[#allocation43_spill]] %s5220_s3 }
   0x5   :  { %5256 = sst [smem:[#allocation44_spill]] %s5221_s4 }
   0x6   :  { %5257 = sst [smem:[#allocation45_spill]] %s5222_s5 }
   0x7   :  { %5258 = sst [smem:[#allocation46_spill]] %s5223_s6 }
   0x8   :  { %5259 = sst [smem:[#allocation47_spill]] %s5239_s22 }
   0x9   :  { %27 = vsyncpa [#allocation3], 0 }
   0xa   :  { %28 = vsyncpa [#allocation6], 0 }
   0xb   :  { %29 = vsyncpa [#allocation9], 0 }
   0xc   :  { %30 = vsyncpa [#allocation12], 0 }
   0xd   :  { %31 = vsyncpa [#allocation15], 0 }
   0xe   :  { %32 = vsyncpa [#allocation18], 0 }
   0xf   :  { %33 = vsyncpa [#allocation21], 0 }
  0x10   :  { %34 = vsyncpa [#allocation24], 0 }
  0x11   :  { %35 = vsyncpa [#allocation27], 0 }
  0x12   :  { %36 = vsyncpa [#allocation4], 0  ;;  %s4554_s3 = smov [#allocation5]   ;;  %s5260_s4 = sld [smem:[#allocation41_spill]] }
  0x13   :  { %s55_s28 = sshll.u32 %s4554_s3, 4  ;;  %s56_s28 = int_to_ptr.vmem [resolvable:$true] %s55_s28 }
  0x18   :  { %s4138_s0 = scalar_lea.hbm %s5260_s4, 128 }
  0x19   :  { %p4139_p0 = scmp.ne.s32.totalorder %s5260_s4, %s4138_s0  ;;  %p4142_p1 = scmp.lt.u32.totalorder %s4138_s0, %s5260_s4 }
  0x1b   :  { %p4144_p2 = pnand %p4142_p1, %p4139_p0 }
  0x1d   :  { %4147 = shalt.err (!%p4144_p2)
}
  0x1e   :  { %s4148_s6 = scalar_lea.vmem %s56_s28, 128  ;;  %p4153_p4 = scmp.lt.s32.totalorder %s56_s28, %s56_s28 }
  0x1f   :  { %p4149_p3 = scmp.ne.s32.totalorder %s56_s28, %s4148_s6  ;;  %p4154_p5 = scmp.lt.s32.totalorder %s4148_s6, %s4148_s6 }
  0x21   :  { %p4155_p6 = por %p4154_p5, %p4153_p4 }
  0x23   :  { %p4156_p7 = pnand %p4155_p6, %p4149_p3 }
  0x25   :  { %4159 = shalt.err (!%p4156_p7)
}
  0x26   :  { %58 = dma.hbm_to_vmem [thread:$0]  %s5260_s4, 128, %s56_s28, [#allocation6]  }
  0x27   :  { %s4555_s2 = smov [#allocation8]   ;;  %s4556_s3 = smov [#allocation11]  }
  0x28   :  { %s78_s27 = sshll.u32 %s4555_s2, 4  ;;  %s104_s29 = sshll.u32 %s4556_s3, 4  ;;  %s79_s27 = int_to_ptr.vmem [resolvable:$true] %s78_s27  ;;  %s105_s29 = int_to_ptr.vmem [resolvable:$true] %s104_s29 }
  0x29   :  { %s5261_s23 = sld [smem:[#allocation44_spill]] }
  0x2f   :  { %s4160_s1 = scalar_lea.hbm %s5261_s23, 2048 }
  0x30   :  { %p4161_p8 = scmp.ne.s32.totalorder %s5261_s23, %s4160_s1  ;;  %p4164_p9 = scmp.lt.u32.totalorder %s4160_s1, %s5261_s23 }
  0x32   :  { %p4166_p10 = pnand %p4164_p9, %p4161_p8 }
  0x34   :  { %4169 = shalt.err (!%p4166_p10)
}
  0x35   :  { %s4170_s28 = scalar_lea.vmem %s79_s27, 2048  ;;  %p4175_p12 = scmp.lt.s32.totalorder %s79_s27, %s79_s27 }
  0x36   :  { %p4171_p11 = scmp.ne.s32.totalorder %s79_s27, %s4170_s28  ;;  %p4176_p13 = scmp.lt.s32.totalorder %s4170_s28, %s4170_s28 }
  0x38   :  { %p4177_p0 = por %p4176_p13, %p4175_p12 }
  0x3a   :  { %p4178_p1 = pnand %p4177_p0, %p4171_p11 }
  0x3c   :  { %4181 = shalt.err (!%p4178_p1)
}
  0x3d   :  { %s5248_s4 = smov 64   ;;  %s5250_s25 = smov 4  }
  0x3e   :  { %84 = dma.hbm_to_vmem [thread:$0]  %s5261_s23, 2048, %s79_s27, [#allocation9], %s5248_s4, %s5248_s4, %s5250_s25  }
  0x3f   :  { %s4182_s30 = scalar_lea.hbm %s5224_s7, 32 }
  0x40   :  { %p4183_p2 = scmp.ne.s32.totalorder %s5224_s7, %s4182_s30  ;;  %p4186_p3 = scmp.lt.u32.totalorder %s4182_s30, %s5224_s7 }
  0x42   :  { %p4188_p4 = pnand %p4186_p3, %p4183_p2 }
  0x44   :  { %4191 = shalt.err (!%p4188_p4)
}
  0x45   :  { %s4192_s6 = scalar_lea.vmem %s105_s29, 32  ;;  %p4197_p6 = scmp.lt.s32.totalorder %s105_s29, %s105_s29 }
  0x46   :  { %p4193_p5 = scmp.ne.s32.totalorder %s105_s29, %s4192_s6  ;;  %p4198_p7 = scmp.lt.s32.totalorder %s4192_s6, %s4192_s6 }
  0x48   :  { %p4199_p8 = por %p4198_p7, %p4197_p6 }
  0x4a   :  { %p4200_p9 = pnand %p4199_p8, %p4193_p5 }
  0x4c   :  { %4203 = shalt.err (!%p4200_p9)
}
  0x4d   :  { %s4559_s27 = smov 16   ;;  %s4560_s23 = smov 1  }
  0x4e   :  { %110 = dma.hbm_to_vmem [thread:$0]  %s5224_s7, 32, %s105_s29, [#allocation12], %s4559_s27, %s4559_s27, %s4560_s23  }
  0x4f   :  { %s4561_s2 = smov [#allocation14]   ;;  %s4562_s3 = smov [#allocation17]  }
  0x50   :  { %s129_s22 = sshll.u32 %s4561_s2, 4  ;;  %s149_s30 = sshll.u32 %s4562_s3, 4  ;;  %s130_s22 = int_to_ptr.vmem [resolvable:$true] %s129_s22  ;;  %s150_s30 = int_to_ptr.vmem [resolvable:$true] %s149_s30 }
  0x51   :  { %s4204_s5 = scalar_lea.hbm %s5226_s9, 16 }
  0x52   :  { %p4205_p10 = scmp.ne.s32.totalorder %s5226_s9, %s4204_s5  ;;  %p4208_p11 = scmp.lt.u32.totalorder %s4204_s5, %s5226_s9 }
  0x54   :  { %p4210_p12 = pnand %p4208_p11, %p4205_p10 }
  0x56   :  { %4213 = shalt.err (!%p4210_p12)
}
  0x57   :  { %s4214_s7 = scalar_lea.vmem %s130_s22, 16  ;;  %s4218_s29 = scalar_lea.vmem %s130_s22, 32 }
  0x58   :  { %p4215_p13 = scmp.ne.s32.totalorder %s130_s22, %s4214_s7  ;;  %p4219_p0 = scmp.lt.s32.totalorder %s130_s22, %s130_s22 }
  0x59   :  { %p4220_p1 = scmp.lt.s32.totalorder %s4218_s29, %s4214_s7 }
  0x5b   :  { %p4221_p2 = por %p4220_p1, %p4219_p0 }
  0x5d   :  { %p4222_p3 = pnand %p4221_p2, %p4215_p13 }
  0x5f   :  { %4225 = shalt.err (!%p4222_p3)
}
  0x60   :  { %132 = dma.hbm_to_vmem [thread:$0]  %s5226_s9, 16, %s130_s22, [#allocation15]  }
  0x61   :  { %s4226_s4 = scalar_lea.hbm %s5228_s11, 16 }
  0x62   :  { %p4227_p4 = scmp.ne.s32.totalorder %s5228_s11, %s4226_s4  ;;  %p4230_p5 = scmp.lt.u32.totalorder %s4226_s4, %s5228_s11 }
  0x64   :  { %p4232_p6 = pnand %p4230_p5, %p4227_p4 }
  0x66   :  { %4235 = shalt.err (!%p4232_p6)
}
  0x67   :  { %s4236_s1 = scalar_lea.vmem %s150_s30, 16  ;;  %s4240_s5 = scalar_lea.vmem %s150_s30, 32 }
  0x68   :  { %p4237_p7 = scmp.ne.s32.totalorder %s150_s30, %s4236_s1  ;;  %p4241_p8 = scmp.lt.s32.totalorder %s150_s30, %s150_s30 }
  0x69   :  { %p4242_p9 = scmp.lt.s32.totalorder %s4240_s5, %s4236_s1 }
  0x6b   :  { %p4243_p10 = por %p4242_p9, %p4241_p8 }
  0x6d   :  { %p4244_p11 = pnand %p4243_p10, %p4237_p7 }
  0x6f   :  { %4247 = shalt.err (!%p4244_p11)
}
  0x70   :  { %152 = dma.hbm_to_vmem [thread:$0]  %s5228_s11, 16, %s150_s30, [#allocation18]  }
  0x71   :  { %s4563_s24 = smov [#allocation20]   ;;  %s4564_s7 = smov [#allocation23]  }
  0x72   :  { %s171_s6 = sshll.u32 %s4563_s24, 4  ;;  %s193_s29 = sshll.u32 %s4564_s7, 4  ;;  %s172_s6 = int_to_ptr.vmem [resolvable:$true] %s171_s6  ;;  %s194_s29 = int_to_ptr.vmem [resolvable:$true] %s193_s29 }
  0x73   :  { %s4248_s28 = scalar_lea.hbm %s5230_s13, 128 }
  0x74   :  { %p4249_p12 = scmp.ne.s32.totalorder %s5230_s13, %s4248_s28  ;;  %p4252_p13 = scmp.lt.u32.totalorder %s4248_s28, %s5230_s13 }
  0x76   :  { %p4254_p0 = pnand %p4252_p13, %p4249_p12 }
  0x78   :  { %4257 = shalt.err (!%p4254_p0)
}
  0x79   :  { %s4258_s11 = scalar_lea.vmem %s172_s6, 128  ;;  %p4263_p2 = scmp.lt.s32.totalorder %s172_s6, %s172_s6 }
  0x7a   :  { %p4259_p1 = scmp.ne.s32.totalorder %s172_s6, %s4258_s11  ;;  %p4264_p3 = scmp.lt.s32.totalorder %s4258_s11, %s4258_s11 }
  0x7c   :  { %p4265_p4 = por %p4264_p3, %p4263_p2 }
  0x7e   :  { %p4266_p5 = pnand %p4265_p4, %p4259_p1 }
  0x80   :  { %4269 = shalt.err (!%p4266_p5)
}
  0x81   :  { %174 = dma.hbm_to_vmem [thread:$0]  %s5230_s13, 128, %s172_s6, [#allocation21]  }
  0x82   :  { %s4270_s5 = scalar_lea.hbm %s5232_s15, 16 }
  0x83   :  { %p4271_p6 = scmp.ne.s32.totalorder %s5232_s15, %s4270_s5  ;;  %p4274_p7 = scmp.lt.u32.totalorder %s4270_s5, %s5232_s15 }
  0x85   :  { %p4276_p8 = pnand %p4274_p7, %p4271_p6 }
  0x87   :  { %4279 = shalt.err (!%p4276_p8)
}
  0x88   :  { %s4280_s27 = scalar_lea.vmem %s194_s29, 16  ;;  %s4284_s23 = scalar_lea.vmem %s194_s29, 32 }
  0x89   :  { %p4281_p9 = scmp.ne.s32.totalorder %s194_s29, %s4280_s27  ;;  %p4285_p10 = scmp.lt.s32.totalorder %s194_s29, %s194_s29 }
  0x8a   :  { %p4286_p11 = scmp.lt.s32.totalorder %s4284_s23, %s4280_s27 }
  0x8c   :  { %p4287_p12 = por %p4286_p11, %p4285_p10 }
  0x8e   :  { %p4288_p13 = pnand %p4287_p12, %p4281_p9 }
  0x90   :  { %4291 = shalt.err (!%p4288_p13)
}
  0x91   :  { %196 = dma.hbm_to_vmem [thread:$0]  %s5232_s15, 16, %s194_s29, [#allocation24]  }
  0x92   :  { %s4565_s28 = smov [#allocation26]   ;;  %s4566_s4 = smov [#allocation2]  }
  0x93   :  { %s213_s26 = sshll.u32 %s4565_s28, 4  ;;  %s42_s25 = sshll.u32 %s4566_s4, 4  ;;  %s214_s26 = int_to_ptr.vmem [resolvable:$true] %s213_s26  ;;  %s43_s25 = int_to_ptr.vmem [resolvable:$true] %s42_s25 }
  0x94   :  { %s4292_s30 = scalar_lea.hbm %s5234_s17, 16 }
  0x95   :  { %p4293_p0 = scmp.ne.s32.totalorder %s5234_s17, %s4292_s30  ;;  %p4296_p1 = scmp.lt.u32.totalorder %s4292_s30, %s5234_s17 }
  0x97   :  { %p4298_p2 = pnand %p4296_p1, %p4293_p0 }
  0x99   :  { %4301 = shalt.err (!%p4298_p2)
}
  0x9a   :  { %s4302_s15 = scalar_lea.vmem %s214_s26, 16  ;;  %s4306_s29 = scalar_lea.vmem %s214_s26, 32 }
  0x9b   :  { %p4303_p3 = scmp.ne.s32.totalorder %s214_s26, %s4302_s15  ;;  %p4307_p4 = scmp.lt.s32.totalorder %s214_s26, %s214_s26 }
  0x9c   :  { %p4308_p5 = scmp.lt.s32.totalorder %s4306_s29, %s4302_s15 }
  0x9e   :  { %p4309_p6 = por %p4308_p5, %p4307_p4 }
  0xa0   :  { %p4310_p7 = pnand %p4309_p6, %p4303_p3 }
  0xa2   :  { %4313 = shalt.err (!%p4310_p7)
}
  0xa3   :  { %216 = dma.hbm_to_vmem [thread:$0]  %s5234_s17, 16, %s214_s26, [#allocation27]  }
  0xa4   :  { %s5262_s27 = sld [smem:[#allocation40_spill]] }
  0xaa   :  { %s4314_s23 = scalar_lea.hbm %s5262_s27, 256 }
  0xab   :  { %p4315_p8 = scmp.ne.s32.totalorder %s5262_s27, %s4314_s23  ;;  %p4318_p9 = scmp.lt.u32.totalorder %s4314_s23, %s5262_s27 }
  0xad   :  { %p4320_p10 = pnand %p4318_p9, %p4315_p8 }
  0xaf   :  { %4323 = shalt.err (!%p4320_p10)
}
  0xb0   :  { %s4324_s2 = scalar_lea.vmem %s43_s25, 256  ;;  %p4329_p12 = scmp.lt.s32.totalorder %s43_s25, %s43_s25 }
  0xb1   :  { %p4325_p11 = scmp.ne.s32.totalorder %s43_s25, %s4324_s2  ;;  %p4330_p13 = scmp.lt.s32.totalorder %s4324_s2, %s4324_s2 }
  0xb3   :  { %p4331_p0 = por %p4330_p13, %p4329_p12 }
  0xb5   :  { %p4332_p1 = pnand %p4331_p0, %p4325_p11 }
  0xb7   :  { %4335 = shalt.err (!%p4332_p1)
}
  0xb8   :  { %s4567_s17 = smov 128   ;;  %s4568_s26 = smov 8  }
  0xb9   :  { %48 = dma.hbm_to_vmem [thread:$0]  %s5262_s27, 256, %s43_s25, [#allocation3], %s4567_s17, %s4567_s17, %s4568_s26  }
  0xba   :  { %s4569_s3 = smov [#allocation7]   ;;  %s4570_s1 = smov [#allocation10]  }
  0xbb   :  { %s64_s0 = sshll.u32 %s4569_s3, 4  ;;  %s92_s5 = sshll.u32 %s4570_s1, 4  ;;  %s65_s0 = int_to_ptr.vmem [resolvable:$true] %s64_s0  ;;  %s93_s5 = int_to_ptr.vmem [resolvable:$true] %s92_s5 }
  0xbc   :  { %s5263_s9 = sld [smem:[#allocation42_spill]] }
  0xc2   :  { %s4336_s22 = scalar_lea.hbm %s5263_s9, 2048 }
  0xc3   :  { %p4337_p2 = scmp.ne.s32.totalorder %s5263_s9, %s4336_s22  ;;  %p4340_p3 = scmp.lt.u32.totalorder %s4336_s22, %s5263_s9 }
  0xc5   :  { %p4342_p4 = pnand %p4340_p3, %p4337_p2 }
  0xc7   :  { %4345 = shalt.err (!%p4342_p4)
}
  0xc8   :  { %s4346_s25 = scalar_lea.vmem %s65_s0, 2048  ;;  %p4351_p6 = scmp.lt.s32.totalorder %s65_s0, %s65_s0 }
  0xc9   :  { %p4347_p5 = scmp.ne.s32.totalorder %s65_s0, %s4346_s25  ;;  %p4352_p7 = scmp.lt.s32.totalorder %s4346_s25, %s4346_s25 }
  0xcb   :  { %p4353_p8 = por %p4352_p7, %p4351_p6 }
  0xcd   :  { %p4354_p9 = pnand %p4353_p8, %p4347_p5 }
  0xcf   :  { %4357 = shalt.err (!%p4354_p9)
}
  0xd0   :  { %s5264_s27 = smov 4   ;;  %s5265_s6 = smov 64  }
  0xd1   :  { %70 = dma.hbm_to_vmem [thread:$0]  %s5263_s9, 2048, %s65_s0, [#allocation6], %s5265_s6, %s5265_s6, %s5264_s27  }
  0xd2   :  { %s5266_s26 = sld [smem:[#allocation46_spill]] }
  0xd8   :  { %s4358_s11 = scalar_lea.hbm %s5266_s26, 2048 }
  0xd9   :  { %p4359_p10 = scmp.ne.s32.totalorder %s5266_s26, %s4358_s11  ;;  %p4362_p11 = scmp.lt.u32.totalorder %s4358_s11, %s5266_s26 }
  0xdb   :  { %p4364_p12 = pnand %p4362_p11, %p4359_p10 }
  0xdd   :  { %4367 = shalt.err (!%p4364_p12)
}
  0xde   :  { %s4368_s29 = scalar_lea.vmem %s93_s5, 2048  ;;  %p4373_p0 = scmp.lt.s32.totalorder %s93_s5, %s93_s5 }
  0xdf   :  { %p4369_p13 = scmp.ne.s32.totalorder %s93_s5, %s4368_s29  ;;  %p4374_p1 = scmp.lt.s32.totalorder %s4368_s29, %s4368_s29 }
  0xe1   :  { %p4375_p2 = por %p4374_p1, %p4373_p0 }
  0xe3   :  { %p4376_p3 = pnand %p4375_p2, %p4369_p13 }
  0xe5   :  { %4379 = shalt.err (!%p4376_p3)
}
  0xe6   :  { %98 = dma.hbm_to_vmem [thread:$0]  %s5266_s26, 2048, %s93_s5, [#allocation9], %s5265_s6, %s5265_s6, %s5264_s27  }
  0xe7   :  { %s4571_s22 = smov [#allocation13]   ;;  %s4572_s7 = smov [#allocation16]  }
  0xe8   :  { %s116_s24 = sshll.u32 %s4571_s22, 4  ;;  %s139_s23 = sshll.u32 %s4572_s7, 4  ;;  %s117_s24 = int_to_ptr.vmem [resolvable:$true] %s116_s24  ;;  %s140_s23 = int_to_ptr.vmem [resolvable:$true] %s139_s23 }
  0xe9   :  { %s4380_s28 = scalar_lea.hbm %s5225_s8, 2048 }
  0xea   :  { %p4381_p4 = scmp.ne.s32.totalorder %s5225_s8, %s4380_s28  ;;  %p4384_p5 = scmp.lt.u32.totalorder %s4380_s28, %s5225_s8 }
  0xec   :  { %p4386_p6 = pnand %p4384_p5, %p4381_p4 }
  0xee   :  { %4389 = shalt.err (!%p4386_p6)
}
  0xef   :  { %s4390_s5 = scalar_lea.vmem %s117_s24, 2048  ;;  %p4395_p8 = scmp.lt.s32.totalorder %s117_s24, %s117_s24 }
  0xf0   :  { %p4391_p7 = scmp.ne.s32.totalorder %s117_s24, %s4390_s5  ;;  %p4396_p9 = scmp.lt.s32.totalorder %s4390_s5, %s4390_s5 }
  0xf2   :  { %p4397_p10 = por %p4396_p9, %p4395_p8 }
  0xf4   :  { %p4398_p11 = pnand %p4397_p10, %p4391_p7 }
  0xf6   :  { %4401 = shalt.err (!%p4398_p11)
}
  0xf7   :  { %122 = dma.hbm_to_vmem [thread:$0]  %s5225_s8, 2048, %s117_s24, [#allocation12], %s5265_s6, %s5265_s6, %s5264_s27  }
  0xf8   :  { %s4402_s15 = scalar_lea.hbm %s5227_s10, 16 }
  0xf9   :  { %p4403_p12 = scmp.ne.s32.totalorder %s5227_s10, %s4402_s15  ;;  %p4406_p13 = scmp.lt.u32.totalorder %s4402_s15, %s5227_s10 }
  0xfb   :  { %p4408_p0 = pnand %p4406_p13, %p4403_p12 }
  0xfd   :  { %4411 = shalt.err (!%p4408_p0)
}
  0xfe   :  { %s4412_s7 = scalar_lea.vmem %s140_s23, 16  ;;  %s4416_s13 = scalar_lea.vmem %s140_s23, 32 }
  0xff   :  { %p4413_p1 = scmp.ne.s32.totalorder %s140_s23, %s4412_s7  ;;  %p4417_p2 = scmp.lt.s32.totalorder %s140_s23, %s140_s23 }
 0x100   :  { %p4418_p3 = scmp.lt.s32.totalorder %s4416_s13, %s4412_s7 }
 0x102   :  { %p4419_p4 = por %p4418_p3, %p4417_p2 }
 0x104   :  { %p4420_p5 = pnand %p4419_p4, %p4413_p1 }
 0x106   :  { %4423 = shalt.err (!%p4420_p5)
}
 0x107   :  { %142 = dma.hbm_to_vmem [thread:$0]  %s5227_s10, 16, %s140_s23, [#allocation15]  }
 0x108   :  { %s4573_s25 = smov [#allocation19]   ;;  %s4424_s17 = scalar_lea.hbm %s5229_s12, 8192 }
 0x109   :  { %s158_s28 = sshll.u32 %s4573_s25, 4  ;;  %p4425_p6 = scmp.ne.s32.totalorder %s5229_s12, %s4424_s17  ;;  %s159_s28 = int_to_ptr.vmem [resolvable:$true] %s158_s28 }
 0x10a   :  { %p4428_p7 = scmp.lt.u32.totalorder %s4424_s17, %s5229_s12 }
 0x10c   :  { %p4430_p8 = pnand %p4428_p7, %p4425_p6 }
 0x10e   :  { %4433 = shalt.err (!%p4430_p8)
}
 0x10f   :  { %s4434_s3 = scalar_lea.vmem %s159_s28, 8192  ;;  %p4439_p10 = scmp.lt.s32.totalorder %s159_s28, %s159_s28 }
 0x110   :  { %p4435_p9 = scmp.ne.s32.totalorder %s159_s28, %s4434_s3  ;;  %p4440_p11 = scmp.lt.s32.totalorder %s4434_s3, %s4434_s3 }
 0x112   :  { %p4441_p12 = por %p4440_p11, %p4439_p10 }
 0x114   :  { %p4442_p13 = pnand %p4441_p12, %p4435_p9 }
 0x116   :  { %4445 = shalt.err (!%p4442_p13)
}
 0x117   :  { %s4574_s10 = smov 512   ;;  %s4575_s23 = smov 32  }
 0x118   :  { %164 = dma.hbm_to_vmem [thread:$0]  %s5229_s12, 8192, %s159_s28, [#allocation18], %s4574_s10, %s4574_s10, %s4575_s23  }
 0x119   :  { %s4576_s29 = smov [#allocation22]   ;;  %s4577_s9 = smov [#allocation25]  }
 0x11a   :  { %s180_s0 = sshll.u32 %s4576_s29, 4  ;;  %s203_s22 = sshll.u32 %s4577_s9, 4  ;;  %s181_s0 = int_to_ptr.vmem [resolvable:$true] %s180_s0  ;;  %s204_s22 = int_to_ptr.vmem [resolvable:$true] %s203_s22 }
 0x11b   :  { %s4446_s8 = scalar_lea.hbm %s5231_s14, 8192 }
 0x11c   :  { %p4447_p0 = scmp.ne.s32.totalorder %s5231_s14, %s4446_s8  ;;  %p4450_p1 = scmp.lt.u32.totalorder %s4446_s8, %s5231_s14 }
 0x11e   :  { %p4452_p2 = pnand %p4450_p1, %p4447_p0 }
 0x120   :  { %4455 = shalt.err (!%p4452_p2)
}
 0x121   :  { %s4456_s12 = scalar_lea.vmem %s181_s0, 8192  ;;  %p4461_p4 = scmp.lt.s32.totalorder %s181_s0, %s181_s0 }
 0x122   :  { %p4457_p3 = scmp.ne.s32.totalorder %s181_s0, %s4456_s12  ;;  %p4462_p5 = scmp.lt.s32.totalorder %s4456_s12, %s4456_s12 }
 0x124   :  { %p4463_p6 = por %p4462_p5, %p4461_p4 }
 0x126   :  { %p4464_p7 = pnand %p4463_p6, %p4457_p3 }
 0x128   :  { %4467 = shalt.err (!%p4464_p7)
}
 0x129   :  { %186 = dma.hbm_to_vmem [thread:$0]  %s5231_s14, 8192, %s181_s0, [#allocation21], %s5265_s6, %s5265_s6, %s5264_s27  }
 0x12a   :  { %s4468_s26 = scalar_lea.hbm %s5233_s16, 16 }
 0x12b   :  { %p4469_p8 = scmp.ne.s32.totalorder %s5233_s16, %s4468_s26  ;;  %p4472_p9 = scmp.lt.u32.totalorder %s4468_s26, %s5233_s16 }
 0x12d   :  { %p4474_p10 = pnand %p4472_p9, %p4469_p8 }
 0x12f   :  { %4477 = shalt.err (!%p4474_p10)
}
 0x130   :  { %s4478_s1 = scalar_lea.vmem %s204_s22, 16  ;;  %s4482_s15 = scalar_lea.vmem %s204_s22, 32 }
 0x131   :  { %p4479_p11 = scmp.ne.s32.totalorder %s204_s22, %s4478_s1  ;;  %p4483_p12 = scmp.lt.s32.totalorder %s204_s22, %s204_s22 }
 0x132   :  { %p4484_p13 = scmp.lt.s32.totalorder %s4482_s15, %s4478_s1 }
 0x134   :  { %p4485_p0 = por %p4484_p13, %p4483_p12 }
 0x136   :  { %p4486_p1 = pnand %p4485_p0, %p4479_p11 }
 0x138   :  { %4489 = shalt.err (!%p4486_p1)
}
 0x139   :  { %206 = dma.hbm_to_vmem [thread:$0]  %s5233_s16, 16, %s204_s22, [#allocation24]  }
 0x13a   :  { %s4578_s0 = smov [#allocation28]   ;;  %s4490_s8 = scalar_lea.hbm %s5237_s20, 1024 }
 0x13b   :  { %s226_s9 = sshll.u32 %s4578_s0, 4  ;;  %p4491_p2 = scmp.ne.s32.totalorder %s5237_s20, %s4490_s8  ;;  %s227_s9 = int_to_ptr.vmem [resolvable:$true] %s226_s9 }
 0x13c   :  { %p4494_p3 = scmp.lt.u32.totalorder %s4490_s8, %s5237_s20 }
 0x13e   :  { %p4496_p4 = pnand %p4494_p3, %p4491_p2 }
 0x140   :  { %4499 = shalt.err (!%p4496_p4)
}
 0x141   :  { %s4500_s12 = scalar_lea.vmem %s227_s9, 1024  ;;  %p4505_p6 = scmp.lt.s32.totalorder %s227_s9, %s227_s9 }
 0x142   :  { %p4501_p5 = scmp.ne.s32.totalorder %s227_s9, %s4500_s12  ;;  %p4506_p7 = scmp.lt.s32.totalorder %s4500_s12, %s4500_s12 }
 0x144   :  { %p4507_p8 = por %p4506_p7, %p4505_p6 }
 0x146   :  { %p4508_p9 = pnand %p4507_p8, %p4501_p5 }
 0x148   :  { %4511 = shalt.err (!%p4508_p9)
}
 0x149   :  { %232 = dma.hbm_to_vmem [thread:$0]  %s5237_s20, 1024, %s227_s9, [#allocation27], %s5265_s6, %s5265_s6, %s5264_s27  }
 0x14a   :  { %4534 = dma.done.wait [#allocation3], 256  }
 0x14b   :  { %4535 = vsyncadd [#allocation3], 4294967040 }
 0x14c   :  { %4536 = dma.done.wait [#allocation6], 2176  }
 0x14d   :  { %4537 = vsyncadd [#allocation6], 4294965120 }
 0x14e   :  { %4538 = dma.done.wait [#allocation9], 4096  }
 0x14f   :  { %4539 = vsyncadd [#allocation9], 4294963200 }
 0x150   :  { %4540 = dma.done.wait [#allocation12], 2080  }
 0x151   :  { %4541 = vsyncadd [#allocation12], 4294965216 }
 0x152   :  { %4542 = dma.done.wait [#allocation15], 32  }
 0x153   :  { %4543 = vsyncadd [#allocation15], 4294967264 }
 0x154   :  { %4544 = dma.done.wait [#allocation18], 8208  }
 0x155   :  { %4545 = vsyncadd [#allocation18], 4294959088 }
 0x156   :  { %4546 = dma.done.wait [#allocation21], 8320  }
 0x157   :  { %4547 = vsyncadd [#allocation21], 4294958976 }
 0x158   :  { %4548 = dma.done.wait [#allocation24], 32  }
 0x159   :  { %4549 = vsyncadd [#allocation24], 4294967264 }
 0x15a   :  { %4550 = dma.done.wait [#allocation27], 1040  }
 0x15b   :  { %4551 = vsyncadd [#allocation27], 4294966256  ;;  %v4579_v0 = vmov 0.0   ;;  %vm4580_vm0 = vmmov 0   ;;  %v3970_v1 = vld [vmem:[#allocation8] sm:$0xff]   ;;  %v3972_v3 = vld [vmem:[#allocation8 + $0x8] sm:$0xff]  }
 0x15c   :  { %3713 = vmatprep.subr.bf16.mxu1 %v4579_v0  ;;  %3693 = vmatprep.subr.bf16.mxu0 %v4579_v0  ;;  %v3971_v2 = vld [vmem:[#allocation7] sm:$0xff]   ;;  %v3973_v4 = vld [vmem:[#allocation7 + $0x8] sm:$0xff]   ;;  %v3974_v5 = vld [vmem:[#allocation8 + $0x10] sm:$0xff]   ;;  %s5267_s6 = sld [smem:[#allocation45_spill]]  ;;  %s5268_s11 = sld [smem:[#allocation43_spill]]  ;;  %vm716_vm1 = vcmask 64512  }
 0x15d   :  { %3729 = vmatprep.mubr.msk.bf16.mxu1 %vm4580_vm0, %v4579_v0  ;;  %3709 = vmatprep.mubr.msk.bf16.mxu0 %vm4580_vm0, %v4579_v0  ;;  %v3975_v6 = vld [vmem:[#allocation7 + $0x10] sm:$0xff]   ;;  %v3976_v7 = vld [vmem:[#allocation8 + $0x18] sm:$0xff]   ;;  %v3978_v9 = vld [vmem:[#allocation8 + $0x20] sm:$0xff]   ;;  %vm744_vm2 = vcmask 1043456   ;;  %vm3042_vm3 = vcmask 1041409   ;;  %s4582_s27 = smov [#allocation29]  }
 0x15e   :  { %3714 = vmatpush3.bf16.msra.mxu1 %v3970_v1  ;;  %3694 = vmatpush3.bf16.msra.mxu0 %v3971_v2  ;;  %v3977_v8 = vld [vmem:[#allocation7 + $0x18] sm:$0xff]   ;;  %v3979_v10 = vld [vmem:[#allocation7 + $0x20] sm:$0xff]   ;;  %v3980_v11 = vld [vmem:[#allocation8 + $0x28] sm:$0xff]  }
 0x15f   :  { %3715 = vmatprep.subr.bf16.mxu1 %v4579_v0  ;;  %3695 = vmatprep.subr.bf16.mxu0 %v4579_v0  ;;  %v3981_v12 = vld [vmem:[#allocation7 + $0x28] sm:$0xff]   ;;  %v3982_v13 = vld [vmem:[#allocation8 + $0x30] sm:$0xff]   ;;  %v289_v16 = vld [vmem:[#allocation5] sm:$0xff] }
 0x160   :  { %v287_v14 = vld [vmem:[#allocation2] sm:$0xff]  ;;  %v288_v15 = vld [vmem:[#allocation2 + $0x8] sm:$0xff]  ;;  %v3984_v18 = vld [vmem:[#allocation8 + $0x38] sm:$0xff]  }
 0x161   :  { %v3983_v17 = vld [vmem:[#allocation7 + $0x30] sm:$0xff]   ;;  %v4938_v19 = vadd.f32 %v289_v16, %v287_v14  ;;  %v4940_v20 = vadd.f32 %v289_v16, %v288_v15  ;;  %v3985_v21 = vld [vmem:[#allocation7 + $0x38] sm:$0xff]   ;;  %v3986_v41 = vld [vmem:[#allocation10] sm:$0xff]  }
 0x162   :  { %3716 = vmatpush3.bf16.msra.mxu1 %v3972_v3  ;;  %3696 = vmatpush3.bf16.msra.mxu0 %v3973_v4  ;;  %v3280_v23 = vld [vmem:[%s5267_s6] ss:$0 sm:$0xff]  ;;  %v3988_v43 = vld [vmem:[#allocation10 + $0x10] sm:$0xff]   ;;  %v3989_v44 = vld [vmem:[#allocation10 + $0x18] sm:$0xff]  }
 0x163   :  { %3717 = vmatprep.subr.bf16.mxu1 %v4579_v0  ;;  %3697 = vmatprep.subr.bf16.mxu0 %v4579_v0  ;;  %v4946_v22 = vpack.c.bf16 %v4940_v20, %v4938_v19  ;;  %v3271_v27 = vld [vmem:[%s5268_s11] ss:$0 sm:$0xff]  ;;  %v3990_v45 = vld [vmem:[#allocation10 + $0x20] sm:$0xff]   ;;  %v3992_v47 = vld [vmem:[#allocation10 + $0x30] sm:$0xff]  }
 0x164   :  { %v3987_v42 = vld [vmem:[#allocation10 + $0x8] sm:$0xff]   ;;  %v3993_v48 = vld [vmem:[#allocation10 + $0x38] sm:$0xff]  }
 0x165   :  { %v3991_v46 = vld [vmem:[#allocation10 + $0x28] sm:$0xff]  }
 0x166   :  { %3718 = vmatpush3.bf16.msra.mxu1 %v3974_v5  ;;  %3698 = vmatpush3.bf16.msra.mxu0 %v3975_v6  ;;  %v3994_v15 = vld [vmem:[#allocation13] sm:$0xff]   ;;  %v3995_v16 = vld [vmem:[#allocation13 + $0x8] sm:$0xff]  }
 0x167   :  { %3719 = vmatprep.subr.bf16.mxu1 %v4579_v0  ;;  %3699 = vmatprep.subr.bf16.mxu0 %v4579_v0 }
 0x16a   :  { %3720 = vmatpush3.bf16.msra.mxu1 %v3976_v7  ;;  %3700 = vmatpush3.bf16.msra.mxu0 %v3977_v8  ;;  %v3289_v8 = vld [vmem:[#allocation11] ss:$0 sm:$0xff] }
 0x16b   :  { %3721 = vmatprep.subr.bf16.mxu1 %v4579_v0  ;;  %3701 = vmatprep.subr.bf16.mxu0 %v4579_v0 }
 0x16e   :  { %3722 = vmatpush3.bf16.msra.mxu1 %v3978_v9  ;;  %3702 = vmatpush3.bf16.msra.mxu0 %v3979_v10 }
 0x16f   :  { %3723 = vmatprep.subr.bf16.mxu1 %v4579_v0  ;;  %3703 = vmatprep.subr.bf16.mxu0 %v4579_v0 }
 0x172   :  { %3724 = vmatpush3.bf16.msra.mxu1 %v3980_v11  ;;  %3704 = vmatpush3.bf16.msra.mxu0 %v3981_v12 }
 0x173   :  { %3725 = vmatprep.subr.bf16.mxu1 %v4579_v0  ;;  %3705 = vmatprep.subr.bf16.mxu0 %v4579_v0 }
 0x176   :  { %3726 = vmatpush3.bf16.msra.mxu1 %v3982_v13  ;;  %3706 = vmatpush3.bf16.msra.mxu0 %v3983_v17  ;;  %v3996_v17 = vld [vmem:[#allocation13 + $0x10] sm:$0xff]  }
 0x177   :  { %3727 = vmatprep.subr.bf16.mxu1 %v4579_v0  ;;  %3707 = vmatprep.subr.bf16.mxu0 %v4579_v0 }
 0x17a   :  { %3728 = vmatpush3.bf16.msra.mxu1 %v3984_v18  ;;  %3708 = vmatpush3.bf16.msra.mxu0 %v3985_v21  ;;  %v3997_v18 = vld [vmem:[#allocation13 + $0x18] sm:$0xff]   ;;  %v3998_v21 = vld [vmem:[#allocation13 + $0x20] sm:$0xff]  }
 0x17b   :  { %3753 = vmatprep.subr.bf16.mxu1 %v4579_v0  ;;  %3733 = vmatprep.subr.bf16.mxu0 %v4579_v0 }
 0x17d   :  { %3730 = vmatmul.mubr.bf16.vlgmr.msra.gmra.mrb[0].mxu1 %v4946_v22  ;;  %3710 = vmatmul.mubr.bf16.vlgmr.msra.gmra.mrb[0].mxu0 %v4946_v22 }
 0x17e   :  { %3755 = vmatprep.mubr.msk.bf16.mxu1 %vm4580_vm0, %v4579_v0  ;;  %3749 = vmatprep.mubr.msk.bf16.mxu0 %vm4580_vm0, %v4579_v0 }
 0x17f   :  { %3734 = vmatpush3.bf16.msra.mxu0 %v3986_v41  ;;  %v4014_v41 = vld [vmem:[#allocation7 + $0x68] sm:$0xff]  }
 0x180   :  { %3735 = vmatprep.subr.bf16.mxu0 %v4579_v0 }
 0x183   :  { %3736 = vmatpush3.bf16.msra.mxu0 %v3987_v42  ;;  %v4016_v42 = vld [vmem:[#allocation7 + $0x70] sm:$0xff]  }
 0x184   :  { %3737 = vmatprep.subr.bf16.mxu0 %v4579_v0 }
 0x187   :  { %3738 = vmatpush3.bf16.msra.mxu0 %v3988_v43  ;;  %v4017_v43 = vld [vmem:[#allocation7 + $0x78] sm:$0xff]  }
 0x188   :  { %3739 = vmatprep.subr.bf16.mxu0 %v4579_v0 }
 0x18b   :  { %3740 = vmatpush3.bf16.msra.mxu0 %v3989_v44  ;;  %v4018_v44 = vld [vmem:[#allocation10 + $0x40] sm:$0xff]  }
 0x18c   :  { %3741 = vmatprep.subr.bf16.mxu0 %v4579_v0 }
 0x18f   :  { %3742 = vmatpush3.bf16.msra.mxu0 %v3990_v45 }
 0x190   :  { %3743 = vmatprep.subr.bf16.mxu0 %v4579_v0 }
 0x193   :  { %3744 = vmatpush3.bf16.msra.mxu0 %v3991_v46 }
 0x194   :  { %3745 = vmatprep.subr.bf16.mxu0 %v4579_v0 }
 0x197   :  { %3746 = vmatpush3.bf16.msra.mxu0 %v3992_v47 }
 0x198   :  { %3747 = vmatprep.subr.bf16.mxu0 %v4579_v0 }
 0x19b   :  { %3748 = vmatpush3.bf16.msra.mxu0 %v3993_v48 }
 0x19c   :  { %3777 = vmatprep.subr.bf16.mxu0 %v4579_v0 }
 0x19e   :  { %3750 = vmatmul.mubr.bf16.vlgmr.msra.gmra.mrb[4].mxu0 %v4946_v22 }
 0x19f   :  { %3793 = vmatprep.mubr.msk.bf16.mxu0 %vm4580_vm0, %v4579_v0  ;;  %3778 = vmatpush3.bf16.msra.mxu0 %v3994_v15 }
 0x1a0   :  { %3779 = vmatprep.subr.bf16.mxu0 %v4579_v0 }
 0x1a3   :  { %3780 = vmatpush3.bf16.msra.mxu0 %v3995_v16 }
 0x1a4   :  { %3781 = vmatprep.subr.bf16.mxu0 %v4579_v0 }
 0x1a7   :  { %3782 = vmatpush3.bf16.msra.mxu0 %v3996_v17  ;;  %v3310_v17 = vld [vmem:[%s5268_s11 + $0x1] ss:$0 sm:$0xff] }
 0x1a8   :  { %3783 = vmatprep.subr.bf16.mxu0 %v4579_v0 }
 0x1ab   :  { %3784 = vmatpush3.bf16.msra.mxu0 %v3997_v18 }
 0x1ac   :  { %3785 = vmatprep.subr.bf16.mxu0 %v4579_v0 }
 0x1af   :  { %3786 = vmatpush3.bf16.msra.mxu0 %v3998_v21 }
 0x1b0   :  { %3787 = vmatprep.subr.bf16.mxu0 %v4579_v0 }
 0x250   :  { %v511_v24 = vpop.f32.mrb[0].mxu1  ;;  %v399_v28 = vpop.f32.mrb[0].mxu0 }
 0x251   :  { %v512_v25 = vadd.f32 %v3280_v23, %v511_v24  ;;  %v3731_v26 = vpop.f32.mrb[1].mxu1  ;;  %v3711_v30 = vpop.f32.mrb[1].mxu0  ;;  %v400_v34 = vadd.f32 %v3271_v27, %v399_v28 }
 0x252   :  { %v514_v29 = vpop.f32.mrb[2].mxu1  ;;  %v402_v33 = vpop.f32.mrb[2].mxu0 }
 0x253   :  { %v632_v31 = vpack.c.bf16 %v512_v25, %v512_v25  ;;  %v3732_v32 = vpop.f32.mrb[3].mxu1  ;;  %v3712_v35 = vpop.f32.mrb[3].mxu0  ;;  %v515_v36 = vadd.f32 %v3280_v23, %v514_v29  ;;  %v630_v37 = vpack.c.bf16 %v400_v34, %v400_v34  ;;  %v403_v39 = vadd.f32 %v3271_v27, %v402_v33  ;;  %v3999_v23 = vld [vmem:[#allocation13 + $0x28] sm:$0xff]   ;;  %v4000_v34 = vld [vmem:[#allocation13 + $0x30] sm:$0xff]  }
 0x254   :  { %3788 = vmatpush3.bf16.msra.mxu0 %v3999_v23  ;;  %v4001_v35 = vld [vmem:[#allocation13 + $0x38] sm:$0xff]  }
 0x255   :  { %3754 = vmatpush3.bf16.xpose.msra.mxu1 %v632_v31  ;;  %v633_v38 = vpack.c.bf16 %v515_v36, %v515_v36  ;;  %v631_v40 = vpack.c.bf16 %v403_v39, %v403_v39  ;;  %3789 = vmatprep.subr.bf16.mxu0 %v4579_v0  ;;  %v4004_v36 = vld [vmem:[#allocation7 + $0x40] sm:$0xff]   ;;  %v4010_v39 = vld [vmem:[#allocation7 + $0x58] sm:$0xff]  }
 0x256   :  { %3759 = vmatprep.subr.bf16.mxu1 %v4579_v0 }
 0x258   :  { %3790 = vmatpush3.bf16.msra.mxu0 %v4000_v34 }
 0x259   :  { %3791 = vmatprep.subr.bf16.mxu0 %v4579_v0 }
 0x25c   :  { %3756 = vmatmul.mubr.bf16.vlgmr.msra.gmra.mrb[4].mxu1 %v630_v37  ;;  %3792 = vmatpush3.bf16.msra.mxu0 %v4001_v35  ;;  %v4006_v37 = vld [vmem:[#allocation7 + $0x48] sm:$0xff]  }
 0x25d   :  { %3760 = vmatpush3.bf16.xpose.msra.mxu1 %v633_v38  ;;  %3761 = vmatprep.mubr.msk.bf16.mxu1 %vm4580_vm0, %v4579_v0  ;;  %v4008_v38 = vld [vmem:[#allocation7 + $0x50] sm:$0xff]  }
 0x25e   :  { %3765 = vmatprep.subr.bf16.mxu1 %v4579_v0  ;;  %3817 = vmatprep.subr.bf16.mxu0 %v4579_v0 }
 0x264   :  { %3762 = vmatmul.mubr.bf16.vlgmr.msra.gmra.mrb[8].mxu1 %v631_v40  ;;  %v4012_v40 = vld [vmem:[#allocation7 + $0x60] sm:$0xff]  }
 0x265   :  { %3767 = vmatprep.mubr.msk.bf16.mxu1 %vm4580_vm0, %v4579_v0 }
 0x271   :  { %v623_v6 = vpop.f32.mrb[4].mxu0 }
 0x272   :  { %v3751_v7 = vpop.f32.mrb[5].mxu0  ;;  %v624_v10 = vadd.f32 %v3289_v8, %v623_v6 }
 0x273   :  { %v626_v9 = vpop.f32.mrb[6].mxu0 }
 0x274   :  { %v3752_v11 = vpop.f32.mrb[7].mxu0  ;;  %v627_v12 = vadd.f32 %v3289_v8, %v626_v9  ;;  %v634_v13 = vpack.c.bf16 %v624_v10, %v624_v10 }
 0x276   :  { %v746_v14 = vsel %vm744_vm2, %v634_v13, 0  ;;  %v635_v28 = vpack.c.bf16 %v627_v12, %v627_v12 }
 0x277   :  { %3766 = vmatpush3.bf16.msra.mxu1 %v746_v14  ;;  %v3320_v14 = vld [vmem:[%s5267_s6 + $0x1] ss:$0 sm:$0xff]  ;;  %s3254_s6 = sshll.u32 %s4582_s27, 4  ;;  %s3255_s6 = int_to_ptr.vmem [resolvable:$true] %s3254_s6 }
 0x278   :  { %3771 = vmatprep.subr.bf16.mxu1 %v4579_v0  ;;  %v792_v30 = vsel %vm744_vm2, %v635_v28, 0  ;;  %p4517_p11 = scmp.lt.s32.totalorder %s3255_s6, %s3255_s6 }
 0x32f   :  { %v670_v49 = vpop.f32.mrb[4].mxu1 }
 0x330   :  { %v3757_v50 = vpop.f32.mrb[5].mxu1  ;;  %v717_v51 = vsel %vm716_vm1, %v670_v49, -inf }
 0x331   :  { %718 = vmax.xlane.f32.xlu0 %v717_v51  ;;  %v673_v52 = vpop.f32.mrb[6].mxu1  ;;  %v4002_v50 = vld [vmem:[#allocation8 + $0x40] sm:$0xff]  }
 0x332   :  { %v3758_v53 = vpop.f32.mrb[7].mxu1 }
 0x337   :  { %v710_v54 = vpop.f32.mrb[8].mxu1 }
 0x338   :  { %v3763_v55 = vpop.f32.mrb[9].mxu1  ;;  %v720_v56 = vsel %vm716_vm1, %v710_v54, -inf }
 0x339   :  { %721 = vmax.xlane.f32.xlu0 %v720_v56  ;;  %v713_v57 = vpop.f32.mrb[10].mxu1  ;;  %v4003_v55 = vld [vmem:[#allocation8 + $0x48] sm:$0xff]   ;;  %v4005_v56 = vld [vmem:[#allocation8 + $0x50] sm:$0xff]  }
 0x33a   :  { %v3764_v58 = vpop.f32.mrb[11].mxu1  ;;  %v4007_v57 = vld [vmem:[#allocation8 + $0x58] sm:$0xff]  }
 0x33b   :  { %v4009_v58 = vld [vmem:[#allocation8 + $0x60] sm:$0xff]  }
 0x3be   :  { %v719_v59 = vpop.xlane.xlu0 %718 }
 0x3bf   :  { %v723_v60 = vsub.f32 %v670_v49, %v719_v59  ;;  %v4011_v59 = vld [vmem:[#allocation8 + $0x68] sm:$0xff]  }
 0x3c1   :  { %v725_v61 = vmul.f32 1.442695, %v723_v60  ;;  %v4013_v60 = vld [vmem:[#allocation8 + $0x70] sm:$0xff]  }
 0x3c3   :  { %4114 = vpow2.f32 %v725_v61  ;;  %v4015_v61 = vld [vmem:[#allocation8 + $0x78] sm:$0xff]  }
 0x3c6   :  { %v722_v62 = vpop.xlane.xlu0 %721 }
 0x3c7   :  { %v724_v63 = vsub.f32 %v710_v54, %v722_v62  ;;  %v4019_v62 = vld [vmem:[#allocation10 + $0x48] sm:$0xff]  }
 0x3c9   :  { %v727_v1 = vmul.f32 1.442695, %v724_v63  ;;  %v4020_v63 = vld [vmem:[#allocation10 + $0x50] sm:$0xff]  }
 0x3cb   :  { %4116 = vpow2.f32 %v727_v1  ;;  %v4021_v1 = vld [vmem:[#allocation10 + $0x58] sm:$0xff]  }
 0x3cd   :  { %v4115_v2 = vpop.eup %4114 }
 0x3ce   :  { %v729_v3 = vsel %vm716_vm1, %v4115_v2, 0.0 }
 0x3cf   :  { %730 = vadd.xlane.f32.xlu1 %v729_v3  ;;  %v4023_v3 = vld [vmem:[#allocation10 + $0x68] sm:$0xff]  }
 0x3d5   :  { %v4117_v4 = vpop.eup %4116 }
 0x3d6   :  { %v732_v5 = vsel %vm716_vm1, %v4117_v4, 0.0 }
 0x3d7   :  { %733 = vadd.xlane.f32.xlu1 %v732_v5  ;;  %v4025_v5 = vld [vmem:[#allocation10 + $0x78] sm:$0xff]  }
 0x45c   :  { %v731_v24 = vpop.xlane.xlu1 %730 }
 0x45d   :  { %4118 = vrcp.f32 %v731_v24 }
 0x464   :  { %v734_v25 = vpop.xlane.xlu1 %733 }
 0x465   :  { %4120 = vrcp.f32 %v734_v25 }
 0x467   :  { %v4119_v26 = vpop.eup %4118 }
 0x468   :  { %v737_v27 = vmul.f32 %v4119_v26, %v4115_v2  ;;  %v4022_v2 = vld [vmem:[#allocation10 + $0x60] sm:$0xff]  }
 0x46a   :  { %v739_v29 = vpack.c.bf16 %v737_v27, %v737_v27 }
 0x46c   :  { %3768 = vmatmul.mubr.msk.bf16.vlgmr.msra.gmra.mrb[12].mxu1 %vm716_vm1, %v739_v29 }
 0x46d   :  { %3772 = vmatpush3.bf16.msra.mxu1 %v792_v30  ;;  %3773 = vmatprep.mubr.msk.bf16.mxu1 %vm4580_vm0, %v4579_v0  ;;  %v3329_v30 = vld [vmem:[#allocation11 + $0x1] ss:$0 sm:$0xff] }
 0x46e   :  { %3797 = vmatprep.subr.bf16.mxu1 %v4579_v0 }
 0x46f   :  { %v4121_v31 = vpop.eup %4120 }
 0x470   :  { %v738_v32 = vmul.f32 %v4121_v31, %v4117_v4  ;;  %v4024_v4 = vld [vmem:[#allocation10 + $0x70] sm:$0xff]  }
 0x472   :  { %v740_v33 = vpack.c.bf16 %v738_v32, %v738_v32 }
 0x474   :  { %3774 = vmatmul.mubr.msk.bf16.vlgmr.msra.gmra.mrb[16].mxu1 %vm716_vm1, %v740_v33 }
 0x475   :  { %3813 = vmatprep.mubr.msk.bf16.mxu1 %vm4580_vm0, %v4579_v0  ;;  %3798 = vmatpush3.bf16.msra.mxu1 %v4004_v36 }
 0x476   :  { %3799 = vmatprep.subr.bf16.mxu1 %v4579_v0 }
 0x479   :  { %3800 = vmatpush3.bf16.msra.mxu1 %v4006_v37 }
 0x47a   :  { %3801 = vmatprep.subr.bf16.mxu1 %v4579_v0 }
 0x47d   :  { %3802 = vmatpush3.bf16.msra.mxu1 %v4008_v38 }
 0x47e   :  { %3803 = vmatprep.subr.bf16.mxu1 %v4579_v0 }
 0x481   :  { %3804 = vmatpush3.bf16.msra.mxu1 %v4010_v39 }
 0x482   :  { %3805 = vmatprep.subr.bf16.mxu1 %v4579_v0 }
 0x485   :  { %3806 = vmatpush3.bf16.msra.mxu1 %v4012_v40 }
 0x486   :  { %3807 = vmatprep.subr.bf16.mxu1 %v4579_v0 }
 0x489   :  { %3808 = vmatpush3.bf16.msra.mxu1 %v4014_v41 }
 0x48a   :  { %3809 = vmatprep.subr.bf16.mxu1 %v4579_v0 }
 0x48d   :  { %3810 = vmatpush3.bf16.msra.mxu1 %v4016_v42 }
 0x48e   :  { %3811 = vmatprep.subr.bf16.mxu1 %v4579_v0 }
 0x491   :  { %3812 = vmatpush3.bf16.msra.mxu1 %v4017_v43 }
 0x492   :  { %3837 = vmatprep.subr.bf16.mxu1 %v4579_v0 }
 0x494   :  { %3814 = vmatmul.mubr.bf16.vlgmr.msra.gmra.mrb[20].mxu1 %v4946_v22 }
 0x495   :  { %3838 = vmatpush3.bf16.msra.mxu1 %v4018_v44  ;;  %3853 = vmatprep.mubr.msk.bf16.mxu1 %vm4580_vm0, %v4579_v0 }
 0x496   :  { %3839 = vmatprep.subr.bf16.mxu1 %v4579_v0 }
 0x499   :  { %3840 = vmatpush3.bf16.msra.mxu1 %v4019_v62  ;;  %v4029_v62 = vld [vmem:[#allocation13 + $0x58] sm:$0xff]  }
 0x49a   :  { %3841 = vmatprep.subr.bf16.mxu1 %v4579_v0 }
 0x49d   :  { %3842 = vmatpush3.bf16.msra.mxu1 %v4020_v63  ;;  %v4030_v63 = vld [vmem:[#allocation13 + $0x60] sm:$0xff]  }
 0x49e   :  { %3843 = vmatprep.subr.bf16.mxu1 %v4579_v0 }
 0x4a1   :  { %3844 = vmatpush3.bf16.msra.mxu1 %v4021_v1 }
 0x4a2   :  { %3845 = vmatprep.subr.bf16.mxu1 %v4579_v0 }
 0x4a5   :  { %3846 = vmatpush3.bf16.msra.mxu1 %v4022_v2 }
 0x4a6   :  { %3847 = vmatprep.subr.bf16.mxu1 %v4579_v0 }
 0x4a9   :  { %3848 = vmatpush3.bf16.msra.mxu1 %v4023_v3 }
 0x4aa   :  { %3849 = vmatprep.subr.bf16.mxu1 %v4579_v0 }
 0x4ad   :  { %3850 = vmatpush3.bf16.msra.mxu1 %v4024_v4 }
 0x4ae   :  { %3851 = vmatprep.subr.bf16.mxu1 %v4579_v0 }
 0x4b1   :  { %3852 = vmatpush3.bf16.msra.mxu1 %v4025_v5 }
 0x4b2   :  { %3857 = vmatprep.subr.bf16.mxu1 %v4579_v0 }
 0x4b4   :  { %3854 = vmatmul.mubr.bf16.vlgmr.msra.gmra.mrb[24].mxu1 %v4946_v22 }
 0x4b5   :  { %3859 = vmatprep.mubr.msk.bf16.mxu1 %vm4580_vm0, %v4579_v0 }
 0x53f   :  { %v782_v45 = vpop.f32.mrb[12].mxu1 }
 0x540   :  { %v3769_v46 = vpop.f32.mrb[13].mxu1 }
 0x541   :  { %v785_v47 = vpop.f32.mrb[14].mxu1 }
 0x542   :  { %v3770_v48 = vpop.f32.mrb[15].mxu1 }
 0x547   :  { %v828_v49 = vpop.f32.mrb[16].mxu1 }
 0x548   :  { %v834_v51 = vpack.c.bf16 %v828_v49, %v782_v45  ;;  %v3775_v52 = vpop.f32.mrb[17].mxu1 }
 0x549   :  { %v831_v53 = vpop.f32.mrb[18].mxu1 }
 0x54a   :  { %v3776_v54 = vpop.f32.mrb[19].mxu1  ;;  %3794 = vmatmul.mubr.bf16.vlgmr.msra.gmra.mrb[8].mxu0 %v834_v51 }
 0x54b   :  { %3818 = vmatpush3.bf16.msra.mxu0 %v4002_v50  ;;  %3833 = vmatprep.mubr.msk.bf16.mxu0 %vm4580_vm0, %v4579_v0 }
 0x54c   :  { %3819 = vmatprep.subr.bf16.mxu0 %v4579_v0 }
 0x54f   :  { %3820 = vmatpush3.bf16.msra.mxu0 %v4003_v55 }
 0x550   :  { %3821 = vmatprep.subr.bf16.mxu0 %v4579_v0 }
 0x553   :  { %3822 = vmatpush3.bf16.msra.mxu0 %v4005_v56 }
 0x554   :  { %3823 = vmatprep.subr.bf16.mxu0 %v4579_v0 }
 0x557   :  { %3824 = vmatpush3.bf16.msra.mxu0 %v4007_v57 }
 0x558   :  { %3825 = vmatprep.subr.bf16.mxu0 %v4579_v0 }
 0x55b   :  { %3826 = vmatpush3.bf16.msra.mxu0 %v4009_v58 }
 0x55c   :  { %3827 = vmatprep.subr.bf16.mxu0 %v4579_v0 }
 0x55f   :  { %3828 = vmatpush3.bf16.msra.mxu0 %v4011_v59  ;;  %v4026_v59 = vld [vmem:[#allocation13 + $0x40] sm:$0xff]  }
 0x560   :  { %3829 = vmatprep.subr.bf16.mxu0 %v4579_v0 }
 0x563   :  { %3830 = vmatpush3.bf16.msra.mxu0 %v4013_v60  ;;  %v4027_v60 = vld [vmem:[#allocation13 + $0x48] sm:$0xff]  }
 0x564   :  { %3831 = vmatprep.subr.bf16.mxu0 %v4579_v0 }
 0x567   :  { %3832 = vmatpush3.bf16.msra.mxu0 %v4015_v61  ;;  %v1055_v6 = vpop.f32.mrb[20].mxu1  ;;  %v4028_v61 = vld [vmem:[#allocation13 + $0x50] sm:$0xff]  }
 0x568   :  { %3881 = vmatprep.subr.bf16.mxu0 %v4579_v0  ;;  %v3815_v7 = vpop.f32.mrb[21].mxu1  ;;  %v1056_v24 = vadd.f32 %v3310_v17, %v1055_v6 }
 0x569   :  { %v1058_v8 = vpop.f32.mrb[22].mxu1 }
 0x56a   :  { %3834 = vmatmul.mubr.bf16.vlgmr.msra.gmra.mrb[12].mxu0 %v4946_v22  ;;  %v3816_v9 = vpop.f32.mrb[23].mxu1  ;;  %v1290_v26 = vpack.c.bf16 %v1056_v24, %v1056_v24  ;;  %v1059_v28 = vadd.f32 %v3310_v17, %v1058_v8 }
 0x56b   :  { %3897 = vmatprep.mubr.msk.bf16.mxu0 %vm4580_vm0, %v4579_v0  ;;  %3882 = vmatpush3.bf16.msra.mxu0 %v4026_v59 }
 0x56c   :  { %v1291_v29 = vpack.c.bf16 %v1059_v28, %v1059_v28  ;;  %3883 = vmatprep.subr.bf16.mxu0 %v4579_v0  ;;  %v1652_v28 = vld [vmem:[#allocation19 + $0x20] sm:$0xff] }
 0x56f   :  { %3884 = vmatpush3.bf16.msra.mxu0 %v4027_v60  ;;  %v1672_v60 = vld [vmem:[#allocation19 + $0xc0] sm:$0xff] }
 0x570   :  { %3885 = vmatprep.subr.bf16.mxu0 %v4579_v0 }
 0x573   :  { %3886 = vmatpush3.bf16.msra.mxu0 %v4028_v61  ;;  %v1676_v61 = vld [vmem:[#allocation19 + $0xe0] sm:$0xff] }
 0x574   :  { %3887 = vmatprep.subr.bf16.mxu0 %v4579_v0 }
 0x577   :  { %3888 = vmatpush3.bf16.msra.mxu0 %v4029_v62  ;;  %v1673_v62 = vld [vmem:[#allocation19 + $0xc8] sm:$0xff] }
 0x578   :  { %3889 = vmatprep.subr.bf16.mxu0 %v4579_v0 }
 0x57b   :  { %3890 = vmatpush3.bf16.msra.mxu0 %v4030_v63  ;;  %v3375_v63 = vcombine.high %v1672_v60, %v1676_v61 }
 0x57c   :  { %3891 = vmatprep.subr.bf16.mxu0 %v4579_v0 }
 0x587   :  { %v1283_v31 = vpop.f32.mrb[24].mxu1 }
 0x588   :  { %v1284_v32 = vadd.f32 %v3329_v30, %v1283_v31  ;;  %v3855_v33 = vpop.f32.mrb[25].mxu1 }
 0x589   :  { %v1286_v34 = vpop.f32.mrb[26].mxu1 }
 0x58a   :  { %v1294_v35 = vpack.c.bf16 %v1284_v32, %v1284_v32  ;;  %v1287_v36 = vadd.f32 %v3329_v30, %v1286_v34  ;;  %v3856_v37 = vpop.f32.mrb[27].mxu1  ;;  %v1653_v32 = vld [vmem:[#allocation19 + $0x28] sm:$0xff] }
 0x58c   :  { %v1404_v38 = vsel %vm744_vm2, %v1294_v35, 0  ;;  %v1295_v4 = vpack.c.bf16 %v1287_v36, %v1287_v36  ;;  %v3308_v35 = vld [vmem:[#allocation14] ss:$0 sm:$0xff] }
 0x58e   :  { %v1450_v7 = vsel %vm744_vm2, %v1295_v4, 0 }
 0x61d   :  { %v5036_v10 = vpop.f32.mrb[8].mxu0 }
 0x61e   :  { %v3795_v11 = vpop.f32.mrb[9].mxu0  ;;  %v946_v36 = vadd.f32 %v3308_v35, %v5036_v10 }
 0x61f   :  { %v5038_v12 = vpop.f32.mrb[10].mxu0 }
 0x620   :  { %v3796_v13 = vpop.f32.mrb[11].mxu0 }
 0x621   :  { %v4031_v13 = vld [vmem:[#allocation13 + $0x68] sm:$0xff]  }
 0x622   :  { %3892 = vmatpush3.bf16.msra.mxu0 %v4031_v13  ;;  %v1688_v13 = vld [vmem:[#allocation19 + $0x140] sm:$0xff] }
 0x623   :  { %3893 = vmatprep.subr.bf16.mxu0 %v4579_v0 }
 0x63d   :  { %v1169_v15 = vpop.f32.mrb[12].mxu0 }
 0x63e   :  { %v1170_v16 = vadd.f32 %v3320_v14, %v1169_v15  ;;  %v3835_v22 = vpop.f32.mrb[13].mxu0  ;;  %v4033_v15 = vld [vmem:[#allocation13 + $0x78] sm:$0xff]  }
 0x63f   :  { %v1172_v18 = vpop.f32.mrb[14].mxu0 }
 0x640   :  { %v1292_v21 = vpack.c.bf16 %v1170_v16, %v1170_v16  ;;  %v3836_v23 = vpop.f32.mrb[15].mxu0  ;;  %v1173_v25 = vadd.f32 %v3320_v14, %v1172_v18  ;;  %v4032_v14 = vld [vmem:[#allocation13 + $0x70] sm:$0xff]  }
 0x641   :  { %3894 = vmatpush3.bf16.msra.mxu0 %v4032_v14  ;;  %v1692_v14 = vld [vmem:[#allocation19 + $0x160] sm:$0xff] }
 0x642   :  { %3858 = vmatpush3.bf16.xpose.msra.mxu1 %v1292_v21  ;;  %v1293_v27 = vpack.c.bf16 %v1173_v25, %v1173_v25  ;;  %3895 = vmatprep.subr.bf16.mxu0 %v4579_v0 }
 0x643   :  { %3863 = vmatprep.subr.bf16.mxu1 %v4579_v0 }
 0x645   :  { %3896 = vmatpush3.bf16.msra.mxu0 %v4033_v15  ;;  %v4581_v15 = vmov 0  }
 0x649   :  { %3860 = vmatmul.mubr.bf16.vlgmr.msra.gmra.mrb[28].mxu1 %v1290_v26 }
 0x64a   :  { %3864 = vmatpush3.bf16.xpose.msra.mxu1 %v1293_v27  ;;  %3865 = vmatprep.mubr.msk.bf16.mxu1 %vm4580_vm0, %v4579_v0  ;;  %v1648_v27 = vld [vmem:[#allocation19] sm:$0xff] }
 0x64b   :  { %3869 = vmatprep.subr.bf16.mxu1 %v4579_v0  ;;  %v3350_v30 = vcombine.low %v1648_v27, %v1652_v28  ;;  %v3351_v31 = vcombine.high %v1648_v27, %v1652_v28  ;;  %v1701_v27 = vld [vmem:[#allocation19 + $0x1a8] sm:$0xff]  ;;  %v3390_v28 = vcombine.low %v1688_v13, %v1692_v14 }
 0x651   :  { %3866 = vmatmul.mubr.bf16.vlgmr.msra.gmra.mrb[32].mxu1 %v1291_v29  ;;  %v1649_v29 = vld [vmem:[#allocation19 + $0x8] sm:$0xff] }
 0x652   :  { %3871 = vmatprep.mubr.msk.bf16.mxu1 %vm4580_vm0, %v4579_v0  ;;  %3870 = vmatpush3.bf16.msra.mxu1 %v1404_v38  ;;  %v3352_v33 = vcombine.low %v1649_v29, %v1653_v32  ;;  %v3353_v34 = vcombine.high %v1649_v29, %v1653_v32  ;;  %v947_v38 = vadd.f32 %v3308_v35, %v5038_v12  ;;  %v5086_v32 = vld [vmem:[#allocation19 + $0x10] sm:$0xff]  ;;  %v1708_v35 = vld [vmem:[#allocation19 + $0x1e0] sm:$0xff] }
 0x653   :  { %3875 = vmatprep.subr.bf16.mxu1 %v4579_v0 }
 0x654   :  { %2117 = vmatprep.subr.bf16.mxu0 %v3353_v34 }
 0x71c   :  { %v1330_v39 = vpop.f32.mrb[28].mxu1 }
 0x71d   :  { %v3861_v40 = vpop.f32.mrb[29].mxu1  ;;  %v1376_v41 = vsel %vm716_vm1, %v1330_v39, -inf }
 0x71e   :  { %1377 = vmax.xlane.f32.xlu0 %v1376_v41  ;;  %v1333_v42 = vpop.f32.mrb[30].mxu1 }
 0x71f   :  { %v3862_v43 = vpop.f32.mrb[31].mxu1 }
 0x724   :  { %v1370_v44 = vpop.f32.mrb[32].mxu1 }
 0x725   :  { %v3867_v45 = vpop.f32.mrb[33].mxu1  ;;  %v1379_v46 = vsel %vm716_vm1, %v1370_v44, -inf }
 0x726   :  { %1380 = vmax.xlane.f32.xlu1 %v1379_v46  ;;  %v1373_v47 = vpop.f32.mrb[34].mxu1  ;;  %v1656_v46 = vld [vmem:[#allocation19 + $0x40] sm:$0xff] }
 0x727   :  { %v3868_v48 = vpop.f32.mrb[35].mxu1  ;;  %v1657_v47 = vld [vmem:[#allocation19 + $0x48] sm:$0xff] }
 0x7ab   :  { %v1378_v49 = vpop.xlane.xlu0 %1377 }
 0x7ac   :  { %v1382_v50 = vsub.f32 %v1330_v39, %v1378_v49  ;;  %v1661_v49 = vld [vmem:[#allocation19 + $0x68] sm:$0xff] }
 0x7ae   :  { %v1384_v51 = vmul.f32 1.442695, %v1382_v50 }
 0x7b0   :  { %4122 = vpow2.f32 %v1384_v51  ;;  %v3361_v51 = vcombine.high %v1657_v47, %v1661_v49 }
 0x7b3   :  { %v1381_v52 = vpop.xlane.xlu1 %1380 }
 0x7b4   :  { %v1383_v53 = vsub.f32 %v1370_v44, %v1381_v52  ;;  %v1664_v52 = vld [vmem:[#allocation19 + $0x80] sm:$0xff] }
 0x7b6   :  { %v1386_v54 = vmul.f32 1.442695, %v1383_v53  ;;  %v1668_v53 = vld [vmem:[#allocation19 + $0xa0] sm:$0xff] }
 0x7b8   :  { %4124 = vpow2.f32 %v1386_v54  ;;  %v1665_v54 = vld [vmem:[#allocation19 + $0x88] sm:$0xff] }
 0x7ba   :  { %v4123_v55 = vpop.eup %4122 }
 0x7bb   :  { %v1388_v56 = vsel %vm716_vm1, %v4123_v55, 0.0 }
 0x7bc   :  { %1389 = vadd.xlane.f32.xlu0 %v1388_v56  ;;  %v1669_v56 = vld [vmem:[#allocation19 + $0xa8] sm:$0xff] }
 0x7bd   :  { %v3369_v59 = vcombine.high %v1665_v54, %v1669_v56 }
 0x7c2   :  { %v4125_v57 = vpop.eup %4124 }
 0x7c3   :  { %v1391_v58 = vsel %vm716_vm1, %v4125_v57, 0.0 }
 0x7c4   :  { %1392 = vadd.xlane.f32.xlu1 %v1391_v58  ;;  %v3368_v58 = vcombine.low %v1665_v54, %v1669_v56 }
 0x849   :  { %v1390_v1 = vpop.xlane.xlu0 %1389 }
 0x84a   :  { %4126 = vrcp.f32 %v1390_v1  ;;  %v1677_v1 = vld [vmem:[#allocation19 + $0xe8] sm:$0xff] }
 0x84b   :  { %v3377_v4 = vcombine.high %v1673_v62, %v1677_v1 }
 0x851   :  { %v1393_v2 = vpop.xlane.xlu1 %1392 }
 0x852   :  { %4128 = vrcp.f32 %v1393_v2  ;;  %v3374_v2 = vcombine.low %v1672_v60, %v1676_v61 }
 0x854   :  { %v4127_v3 = vpop.eup %4126 }
 0x855   :  { %v1396_v5 = vmul.f32 %v4127_v3, %v4123_v55  ;;  %v3367_v55 = vcombine.high %v1664_v52, %v1668_v53  ;;  %v3376_v3 = vcombine.low %v1673_v62, %v1677_v1  ;;  %v3348_v1 = vld [vmem:[#allocation16] ss:$0 sm:$0xff] }
 0x857   :  { %v1398_v6 = vpack.c.bf16 %v1396_v5, %v1396_v5  ;;  %v1680_v5 = vld [vmem:[#allocation19 + $0x100] sm:$0xff] }
 0x859   :  { %3872 = vmatmul.mubr.msk.bf16.vlgmr.msra.gmra.mrb[36].mxu1 %vm716_vm1, %v1398_v6  ;;  %v1684_v6 = vld [vmem:[#allocation19 + $0x120] sm:$0xff] }
 0x85a   :  { %3876 = vmatpush3.bf16.msra.mxu1 %v1450_v7  ;;  %3877 = vmatprep.mubr.msk.bf16.mxu1 %vm4580_vm0, %v4579_v0  ;;  %v1681_v7 = vld [vmem:[#allocation19 + $0x108] sm:$0xff] }
 0x85b   :  { %2074 = vmatprep.subr.bf16.mxu1 %v3351_v31  ;;  %v1704_v31 = vld [vmem:[#allocation19 + $0x1c0] sm:$0xff] }
 0x85c   :  { %v4129_v8 = vpop.eup %4128 }
 0x85d   :  { %v1397_v9 = vmul.f32 %v4129_v8, %v4125_v57  ;;  %v3366_v57 = vcombine.low %v1664_v52, %v1668_v53  ;;  %v3382_v8 = vcombine.low %v1680_v5, %v1684_v6 }
 0x85f   :  { %v1399_v11 = vpack.c.bf16 %v1397_v9, %v1397_v9  ;;  %v3383_v9 = vcombine.high %v1680_v5, %v1684_v6 }
 0x861   :  { %3878 = vmatmul.mubr.msk.bf16.vlgmr.msra.gmra.mrb[40].mxu1 %vm716_vm1, %v1399_v11  ;;  %v1685_v11 = vld [vmem:[#allocation19 + $0x128] sm:$0xff] }
 0x862   :  { %2075 = vmatpush1.bf16.msra.mxu1 %v3350_v30  ;;  %2106 = vmatprep.mubr.bf16.mxu1 %v4581_v15 }
 0x92c   :  { %v1440_v16 = vpop.f32.mrb[36].mxu1 }
 0x92d   :  { %v3873_v22 = vpop.f32.mrb[37].mxu1 }
 0x92e   :  { %v1443_v17 = vpop.f32.mrb[38].mxu1  ;;  %v3385_v22 = vcombine.high %v1681_v7, %v1685_v11 }
 0x92f   :  { %v3874_v18 = vpop.f32.mrb[39].mxu1  ;;  %v3391_v17 = vcombine.high %v1688_v13, %v1692_v14  ;;  %v1659_v13 = vld [vmem:[#allocation19 + $0x58] sm:$0xff] }
 0x930   :  { %v1689_v18 = vld [vmem:[#allocation19 + $0x148] sm:$0xff]  ;;  %v1663_v14 = vld [vmem:[#allocation19 + $0x78] sm:$0xff] }
 0x934   :  { %v1486_v21 = vpop.f32.mrb[40].mxu1 }
 0x935   :  { %v1492_v23 = vpack.c.bf16 %v1486_v21, %v1440_v16  ;;  %v3879_v24 = vpop.f32.mrb[41].mxu1  ;;  %v3384_v16 = vcombine.low %v1681_v7, %v1685_v11  ;;  %v1693_v21 = vld [vmem:[#allocation19 + $0x168] sm:$0xff]  ;;  %v3349_v7 = vld [vmem:[#allocation17] ss:$0 sm:$0xff]  ;;  %v1662_v11 = vld [vmem:[#allocation19 + $0x70] sm:$0xff] }
 0x936   :  { %v1489_v25 = vpop.f32.mrb[42].mxu1  ;;  %v3393_v24 = vcombine.high %v1689_v18, %v1693_v21  ;;  %v3392_v29 = vcombine.low %v1689_v18, %v1693_v21  ;;  %v1666_v18 = vld [vmem:[#allocation19 + $0x90] sm:$0xff] }
 0x937   :  { %v3880_v26 = vpop.f32.mrb[43].mxu1  ;;  %3898 = vmatmul.mubr.bf16.vlgmr.msra.gmra.mrb[16].mxu0 %v1492_v23  ;;  %v1696_v23 = vld [vmem:[#allocation19 + $0x180] sm:$0xff]  ;;  %v1670_v21 = vld [vmem:[#allocation19 + $0xb0] sm:$0xff] }
 0x938   :  { %2118 = vmatpush1.bf16.msra.mxu0 %v3352_v33  ;;  %2149 = vmatprep.mubr.bf16.mxu0 %v4581_v15  ;;  %v1700_v25 = vld [vmem:[#allocation19 + $0x1a0] sm:$0xff]  ;;  %v1697_v26 = vld [vmem:[#allocation19 + $0x188] sm:$0xff]  ;;  %v5088_v33 = vld [vmem:[#allocation19 + $0x30] sm:$0xff] }
 0x939   :  { %2119 = vmatprep.subr.bf16.mxu0 %v3361_v51  ;;  %v3399_v30 = vcombine.high %v1696_v23, %v1700_v25  ;;  %v3401_v34 = vcombine.high %v1697_v26, %v1701_v27 }
 0xa0a   :  { %v1592_v37 = vpop.f32.mrb[16].mxu0 }
 0xa0b   :  { %v1599_v39 = vadd.f32 %v1592_v37, %v946_v36  ;;  %v3899_v40 = vpop.f32.mrb[17].mxu0  ;;  %v3354_v36 = vcombine.low %v5086_v32, %v5088_v33  ;;  %v5092_v37 = vld [vmem:[#allocation19 + $0x18] sm:$0xff] }
 0xa0c   :  { %v1595_v41 = vpop.f32.mrb[18].mxu0  ;;  %v1709_v40 = vld [vmem:[#allocation19 + $0x1e8] sm:$0xff] }
 0xa0d   :  { %v5073_v42 = vadd.f32 %v1599_v39, %v4938_v19  ;;  %v1600_v43 = vadd.f32 %v1595_v41, %v947_v38  ;;  %v3900_v44 = vpop.f32.mrb[19].mxu0  ;;  %v1660_v19 = vld [vmem:[#allocation19 + $0x60] sm:$0xff]  ;;  %v5094_v38 = vld [vmem:[#allocation19 + $0x38] sm:$0xff]  ;;  %v1705_v39 = vld [vmem:[#allocation19 + $0x1c8] sm:$0xff] }
 0xa0e   :  { %v3359_v48 = vcombine.high %v1656_v46, %v1660_v19  ;;  %v3358_v50 = vcombine.low %v1656_v46, %v1660_v19  ;;  %v3356_v41 = vcombine.low %v5092_v37, %v5094_v38  ;;  %v3400_v44 = vcombine.low %v1697_v26, %v1701_v27 }
 0xa0f   :  { %v5076_v45 = vadd.f32 %v1600_v43, %v4940_v20  ;;  %1605 = vadd.xlane.f32.xlu0 %v5073_v42  ;;  %v1611_v10 = vmul.f32 %v5073_v42, %v5073_v42  ;;  %v3360_v20 = vcombine.low %v1657_v47, %v1661_v49  ;;  %v3398_v43 = vcombine.low %v1696_v23, %v1700_v25  ;;  %v1667_v23 = vld [vmem:[#allocation19 + $0x98] sm:$0xff] }
 0xa10   :  { %2076 = vmatprep.subr.bf16.mxu1 %v3359_v48  ;;  %v3406_v46 = vcombine.low %v1704_v31, %v1708_v35  ;;  %v3408_v19 = vcombine.low %v1705_v39, %v1709_v40  ;;  %v3355_v47 = vcombine.high %v5086_v32, %v5088_v33  ;;  %v3357_v48 = vcombine.high %v5092_v37, %v5094_v38  ;;  %v1682_v37 = vld [vmem:[#allocation19 + $0x110] sm:$0xff] }
 0xa11   :  { %1607 = vadd.xlane.f32.xlu1 %v5076_v45  ;;  %v1612_v12 = vmul.f32 %v5076_v45, %v5076_v45  ;;  %2077 = vmatpush1.bf16.msra.mxu1 %v3358_v50  ;;  %v3364_v26 = vcombine.low %v1659_v13, %v1663_v14  ;;  %v3371_v27 = vcombine.high %v1666_v18, %v1670_v21  ;;  %v1686_v38 = vld [vmem:[#allocation19 + $0x130] sm:$0xff] }
 0xa12   :  { %2120 = vmatpush1.bf16.msra.mxu0 %v3360_v20  ;;  %2078 = vmatprep.subr.bf16.mxu1 %v3367_v55 }
 0xa13   :  { %1613 = vadd.xlane.f32.xlu0 %v1611_v10  ;;  %2121 = vmatprep.subr.bf16.mxu0 %v3369_v59  ;;  %v3407_v10 = vcombine.high %v1704_v31, %v1708_v35  ;;  %v1675_v31 = vld [vmem:[#allocation19 + $0xd8] sm:$0xff]  ;;  %v3370_v35 = vcombine.low %v1666_v18, %v1670_v21 }
 0xa14   :  { %v4044_v18 = vld [vmem:[#allocation22 + $0x10] sm:$0xff]  }
 0xa15   :  { %1615 = vadd.xlane.f32.xlu1 %v1612_v12  ;;  %2079 = vmatpush1.bf16.msra.mxu1 %v3366_v57  ;;  %v3409_v12 = vcombine.high %v1705_v39, %v1709_v40  ;;  %v1683_v39 = vld [vmem:[#allocation19 + $0x118] sm:$0xff] }
 0xa16   :  { %2122 = vmatpush1.bf16.msra.mxu0 %v3368_v58  ;;  %2080 = vmatprep.subr.bf16.mxu1 %v3375_v63  ;;  %v1687_v40 = vld [vmem:[#allocation19 + $0x138] sm:$0xff] }
 0xa17   :  { %2123 = vmatprep.subr.bf16.mxu0 %v3377_v4  ;;  %v4045_v21 = vld [vmem:[#allocation22 + $0x90] sm:$0xff]  }
 0xa19   :  { %2081 = vmatpush1.bf16.msra.mxu1 %v3374_v2 }
 0xa1a   :  { %2124 = vmatpush1.bf16.msra.mxu0 %v3376_v3  ;;  %2082 = vmatprep.subr.bf16.mxu1 %v3383_v9  ;;  %v1658_v9 = vld [vmem:[#allocation19 + $0x50] sm:$0xff] }
 0xa1b   :  { %2125 = vmatprep.subr.bf16.mxu0 %v3385_v22  ;;  %v3362_v25 = vcombine.low %v1658_v9, %v1662_v11 }
 0xa1d   :  { %2083 = vmatpush1.bf16.msra.mxu1 %v3382_v8 }
 0xa1e   :  { %2126 = vmatpush1.bf16.msra.mxu0 %v3384_v16  ;;  %2084 = vmatprep.subr.bf16.mxu1 %v3391_v17  ;;  %v3363_v17 = vcombine.high %v1658_v9, %v1662_v11  ;;  %v4038_v9 = vld [vmem:[#allocation22 + $0x48] sm:$0xff]  }
 0xa1f   :  { %2127 = vmatprep.subr.bf16.mxu0 %v3393_v24  ;;  %v1671_v24 = vld [vmem:[#allocation19 + $0xb8] sm:$0xff]  ;;  %v4039_v11 = vld [vmem:[#allocation22 + $0xc8] sm:$0xff]  }
 0xa20   :  { %v3372_v32 = vcombine.low %v1667_v23, %v1671_v24 }
 0xa21   :  { %2085 = vmatpush1.bf16.msra.mxu1 %v3390_v28  ;;  %v3373_v28 = vcombine.high %v1667_v23, %v1671_v24  ;;  %v4046_v23 = vld [vmem:[#allocation22 + $0x58] sm:$0xff]  }
 0xa22   :  { %2128 = vmatpush1.bf16.msra.mxu0 %v3392_v29  ;;  %2086 = vmatprep.subr.bf16.mxu1 %v3399_v30  ;;  %v1674_v29 = vld [vmem:[#allocation19 + $0xd0] sm:$0xff]  ;;  %v4047_v24 = vld [vmem:[#allocation22 + $0xd8] sm:$0xff]  }
 0xa23   :  { %2129 = vmatprep.subr.bf16.mxu0 %v3401_v34  ;;  %v1678_v30 = vld [vmem:[#allocation19 + $0xf0] sm:$0xff]  ;;  %v1679_v34 = vld [vmem:[#allocation19 + $0xf8] sm:$0xff] }
 0xa24   :  { %v3379_v33 = vcombine.high %v1674_v29, %v1678_v30 }
 0xa25   :  { %2087 = vmatpush1.bf16.msra.mxu1 %v3398_v43  ;;  %v3380_v43 = vcombine.low %v1675_v31, %v1679_v34 }
 0xa26   :  { %2130 = vmatpush1.bf16.msra.mxu0 %v3400_v44  ;;  %2088 = vmatprep.subr.bf16.mxu1 %v3407_v10  ;;  %v3387_v44 = vcombine.high %v1682_v37, %v1686_v38  ;;  %v1690_v10 = vld [vmem:[#allocation19 + $0x150] sm:$0xff] }
 0xa27   :  { %2131 = vmatprep.subr.bf16.mxu0 %v3409_v12  ;;  %v1694_v12 = vld [vmem:[#allocation19 + $0x170] sm:$0xff] }
 0xa29   :  { %2089 = vmatpush1.bf16.msra.mxu1 %v3406_v46  ;;  %v1691_v46 = vld [vmem:[#allocation19 + $0x158] sm:$0xff] }
 0xa2a   :  { %2132 = vmatpush1.bf16.msra.mxu0 %v3408_v19  ;;  %2160 = vmatprep.subr.bf16.mxu1 %v3355_v47  ;;  %v1695_v19 = vld [vmem:[#allocation19 + $0x178] sm:$0xff]  ;;  %v3386_v47 = vcombine.low %v1682_v37, %v1686_v38  ;;  %v4062_v38 = vld [vmem:[#allocation22 + $0x78] sm:$0xff]  }
 0xa2b   :  { %2203 = vmatprep.subr.bf16.mxu0 %v3357_v48  ;;  %v3388_v48 = vcombine.low %v1683_v39, %v1687_v40  ;;  %v4061_v37 = vld [vmem:[#allocation22 + $0xb0] sm:$0xff]  }
 0xa9c   :  { %v1606_v49 = vpop.xlane.xlu0 %1605 }
 0xa9d   :  { %v1609_v50 = vmul.f32 0.0125, %v1606_v49  ;;  %v3395_v49 = vcombine.high %v1690_v10, %v1694_v12 }
 0xa9e   :  { %v1608_v20 = vpop.xlane.xlu1 %1607 }
 0xa9f   :  { %v1610_v51 = vmul.f32 0.0125, %v1608_v20  ;;  %v1619_v53 = vmul.f32 %v1609_v50, %v1609_v50  ;;  %v1623_v62 = vsub.f32 %v5073_v42, %v1609_v50  ;;  %v3397_v50 = vcombine.high %v1691_v46, %v1695_v19  ;;  %v1698_v20 = vld [vmem:[#allocation19 + $0x190] sm:$0xff] }
 0xaa0   :  { %v1614_v52 = vpop.xlane.xlu0 %1613 }
 0xaa1   :  { %v1617_v54 = vmul.f32 0.0125, %v1614_v52  ;;  %v1620_v56 = vmul.f32 %v1610_v51, %v1610_v51  ;;  %v1624_v2 = vsub.f32 %v5076_v45, %v1610_v51  ;;  %v3365_v45 = vcombine.high %v1659_v13, %v1663_v14  ;;  %v1702_v51 = vld [vmem:[#allocation19 + $0x1b0] sm:$0xff]  ;;  %v1699_v52 = vld [vmem:[#allocation19 + $0x198] sm:$0xff] }
 0xaa2   :  { %v1616_v55 = vpop.xlane.xlu1 %1615  ;;  %v4040_v13 = vld [vmem:[#allocation22 + $0x8] sm:$0xff]  }
 0xaa3   :  { %v1621_v57 = vsub.f32 %v1617_v54, %v1619_v53  ;;  %v1618_v58 = vmul.f32 0.0125, %v1616_v55  ;;  %v1703_v53 = vld [vmem:[#allocation19 + $0x1b8] sm:$0xff]  ;;  %v3394_v54 = vcombine.low %v1690_v10, %v1694_v12  ;;  %v3396_v55 = vcombine.low %v1691_v46, %v1695_v19  ;;  %v4041_v14 = vld [vmem:[#allocation22 + $0x88] sm:$0xff]   ;;  %v5125_v19 = vld [vmem:[#allocation20] sm:$0xff] }
 0xaa5   :  { %v1625_v59 = vadd.f32 1e-05, %v1621_v57  ;;  %v1622_v60 = vsub.f32 %v1618_v58, %v1620_v56  ;;  %v3403_v56 = vcombine.high %v1698_v20, %v1702_v51  ;;  %v3405_v57 = vcombine.high %v1699_v52, %v1703_v53  ;;  %v1706_v58 = vld [vmem:[#allocation19 + $0x1d0] sm:$0xff] }
 0xaa7   :  { %4130 = vrsqrt.f32 %v1625_v59  ;;  %v1626_v61 = vadd.f32 1e-05, %v1622_v60  ;;  %v1710_v59 = vld [vmem:[#allocation19 + $0x1f0] sm:$0xff]  ;;  %v1707_v60 = vld [vmem:[#allocation19 + $0x1d8] sm:$0xff] }
 0xaa9   :  { %4132 = vrsqrt.f32 %v1626_v61  ;;  %v1711_v61 = vld [vmem:[#allocation19 + $0x1f8] sm:$0xff] }
 0xab1   :  { %v4131_v63 = vpop.eup %4130 }
 0xab2   :  { %v1629_v3 = vmul.f32 %v4131_v63, %v1623_v62  ;;  %v3402_v62 = vcombine.low %v1698_v20, %v1702_v51  ;;  %v3404_v63 = vcombine.low %v1699_v52, %v1703_v53 }
 0xab3   :  { %v4133_v4 = vpop.eup %4132 }
 0xab4   :  { %v1630_v5 = vmul.f32 %v4133_v4, %v1624_v2  ;;  %v1637_v6 = vmul.f32 %v3348_v1, %v1629_v3  ;;  %v3413_v2 = vcombine.high %v1707_v60, %v1711_v61  ;;  %v3410_v3 = vcombine.low %v1706_v58, %v1710_v59 }
 0xab5   :  { %v3412_v4 = vcombine.low %v1707_v60, %v1711_v61 }
 0xab6   :  { %v1638_v8 = vmul.f32 %v3348_v1, %v1630_v5  ;;  %v5104_v16 = vadd.f32 %v3349_v7, %v1637_v6  ;;  %v3411_v1 = vcombine.high %v1706_v58, %v1710_v59  ;;  %v4034_v5 = vld [vmem:[#allocation22 + $0x40] sm:$0xff]  }
 0xab7   :  { %v4035_v6 = vld [vmem:[#allocation22 + $0xc0] sm:$0xff]  }
 0xab8   :  { %v5106_v22 = vadd.f32 %v3349_v7, %v1638_v8  ;;  %v4036_v7 = vld [vmem:[#allocation22] sm:$0xff]  }
 0xab9   :  { %v4037_v8 = vld [vmem:[#allocation22 + $0x80] sm:$0xff]  }
 0xaba   :  { %v5110_v42 = vpack.c.bf16 %v5106_v22, %v5104_v16 }
 0xabc   :  { %2107 = vmatmul.mubr.bf16.vlgmr.msra.gmra.mrb[44].mxu1 %v5110_v42  ;;  %2150 = vmatmul.mubr.bf16.vlgmr.msra.gmra.mrb[20].mxu0 %v5110_v42 }
 0xabd   :  { %2161 = vmatpush1.bf16.msra.mxu1 %v3354_v36  ;;  %2204 = vmatpush1.bf16.msra.mxu0 %v3356_v41  ;;  %v3381_v36 = vcombine.high %v1675_v31, %v1679_v34  ;;  %v3378_v41 = vcombine.low %v1674_v29, %v1678_v30  ;;  %v4053_v29 = vld [vmem:[#allocation22 + $0xa0] sm:$0xff]   ;;  %v4054_v30 = vld [vmem:[#allocation22 + $0x68] sm:$0xff]  }
 0xabe   :  { %2162 = vmatprep.subr.bf16.mxu1 %v3363_v17  ;;  %2205 = vmatprep.subr.bf16.mxu0 %v3365_v45  ;;  %v4042_v17 = vld [vmem:[#allocation22 + $0x50] sm:$0xff]   ;;  %v4055_v31 = vld [vmem:[#allocation22 + $0xe8] sm:$0xff]  }
 0xabf   :  { %2192 = vmatprep.mubr.bf16.mxu1 %v4581_v15  ;;  %2235 = vmatprep.mubr.bf16.mxu0 %v4581_v15  ;;  %v3389_v15 = vcombine.high %v1683_v39, %v1687_v40  ;;  %v4043_v45 = vld [vmem:[#allocation22 + $0xd0] sm:$0xff]   ;;  %v4056_v34 = vld [vmem:[#allocation22 + $0x28] sm:$0xff]   ;;  %v4063_v39 = vld [vmem:[#allocation22 + $0xf8] sm:$0xff]  }
 0xac0   :  { %v4064_v40 = vld [vmem:[#allocation22 + $0x38] sm:$0xff]  }
 0xac1   :  { %2163 = vmatpush1.bf16.msra.mxu1 %v3362_v25  ;;  %2206 = vmatpush1.bf16.msra.mxu0 %v3364_v26  ;;  %v4048_v25 = vld [vmem:[#allocation22 + $0x18] sm:$0xff]   ;;  %v4050_v26 = vld [vmem:[#allocation22 + $0x60] sm:$0xff]  }
 0xac2   :  { %2164 = vmatprep.subr.bf16.mxu1 %v3371_v27  ;;  %2207 = vmatprep.subr.bf16.mxu0 %v3373_v28  ;;  %v4051_v27 = vld [vmem:[#allocation22 + $0xe0] sm:$0xff]  }
 0xac3   :  { %v4052_v28 = vld [vmem:[#allocation22 + $0x20] sm:$0xff]  }
 0xac5   :  { %2165 = vmatpush1.bf16.msra.mxu1 %v3370_v35  ;;  %2208 = vmatpush1.bf16.msra.mxu0 %v3372_v32  ;;  %v4057_v35 = vld [vmem:[#allocation22 + $0xa8] sm:$0xff]   ;;  %v4058_v32 = vld [vmem:[#allocation22 + $0x70] sm:$0xff]  }
 0xac6   :  { %2166 = vmatprep.subr.bf16.mxu1 %v3379_v33  ;;  %2209 = vmatprep.subr.bf16.mxu0 %v3381_v36  ;;  %v4059_v33 = vld [vmem:[#allocation22 + $0xf0] sm:$0xff]  }
 0xac7   :  { %v4060_v36 = vld [vmem:[#allocation22 + $0x30] sm:$0xff]  }
 0xac9   :  { %2167 = vmatpush1.bf16.msra.mxu1 %v3378_v41  ;;  %2210 = vmatpush1.bf16.msra.mxu0 %v3380_v43  ;;  %v4065_v41 = vld [vmem:[#allocation22 + $0xb8] sm:$0xff]   ;;  %v4066_v43 = vld [vmem:[#allocation22 + $0x140] sm:$0xff]  }
 0xaca   :  { %2168 = vmatprep.subr.bf16.mxu1 %v3387_v44  ;;  %2211 = vmatprep.subr.bf16.mxu0 %v3389_v15  ;;  %v4067_v44 = vld [vmem:[#allocation22 + $0x1c0] sm:$0xff]   ;;  %v1714_v15 = vlaneseq }
 0xacc   :  { %v5121_v10 = vshrl.u32 %v1714_v15, 7 }
 0xacd   :  { %2169 = vmatpush1.bf16.msra.mxu1 %v3386_v47  ;;  %2212 = vmatpush1.bf16.msra.mxu0 %v3388_v48 }
 0xace   :  { %2170 = vmatprep.subr.bf16.mxu1 %v3395_v49  ;;  %2213 = vmatprep.subr.bf16.mxu0 %v3397_v50  ;;  %v1716_v12 = vsub.s32 0, %v5121_v10  ;;  %v1724_v46 = vsub.s32 2, %v5121_v10  ;;  %v1720_v47 = vsub.s32 1, %v5121_v10  ;;  %v1728_v48 = vsub.s32 3, %v5121_v10 }
 0xacf   :  { %v1736_v15 = vsub.s32 5, %v5121_v10 }
 0xad0   :  { %v1717_v49 = vrot.slane %v5125_v19, %v1716_v12  ;;  %v1725_v50 = vrot.slane %v5125_v19, %v1724_v46  ;;  %v1721_v20 = vrot.slane %v5125_v19, %v1720_v47  ;;  %v1729_v51 = vrot.slane %v5125_v19, %v1728_v48  ;;  %v4088_v46 = vld [vmem:[#allocation22 + $0x128] sm:$0xff]  }
 0xad1   :  { %2171 = vmatpush1.bf16.msra.mxu1 %v3394_v54  ;;  %2214 = vmatpush1.bf16.msra.mxu0 %v3396_v55  ;;  %v1744_v12 = vsub.s32 7, %v5121_v10  ;;  %v4089_v47 = vld [vmem:[#allocation22 + $0x1a8] sm:$0xff]  }
 0xad2   :  { %2172 = vmatprep.subr.bf16.mxu1 %v3403_v56  ;;  %2215 = vmatprep.subr.bf16.mxu0 %v3405_v57 }
 0xad5   :  { %2173 = vmatpush1.bf16.msra.mxu1 %v3402_v62  ;;  %2216 = vmatpush1.bf16.msra.mxu0 %v3404_v63 }
 0xad6   :  { %2174 = vmatprep.subr.bf16.mxu1 %v3411_v1  ;;  %2217 = vmatprep.subr.bf16.mxu0 %v3413_v2 }
 0xad9   :  { %2175 = vmatpush1.bf16.msra.mxu1 %v3410_v3  ;;  %2218 = vmatpush1.bf16.msra.mxu0 %v3412_v4 }
 0xada   :  { %3587 = vmatprep.subr.bf16.mxu1 %v4034_v5  ;;  %3609 = vmatprep.subr.bf16.mxu0 %v4035_v6 }
 0xadc   :  { %2193 = vmatmul.mubr.bf16.vlgmr.msra.gmra.mrb[48].mxu1 %v5110_v42  ;;  %2236 = vmatmul.mubr.bf16.vlgmr.msra.gmra.mrb[24].mxu0 %v5110_v42  ;;  %v4049_v42 = vld [vmem:[#allocation22 + $0x98] sm:$0xff]  }
 0xadd   :  { %3588 = vmatpush3.bf16.msra.mxu1 %v4036_v7  ;;  %3610 = vmatpush3.bf16.msra.mxu0 %v4037_v8 }
 0xade   :  { %3589 = vmatprep.subr.bf16.mxu1 %v4038_v9  ;;  %3611 = vmatprep.subr.bf16.mxu0 %v4039_v11 }
 0xae1   :  { %3590 = vmatpush3.bf16.msra.mxu1 %v4040_v13  ;;  %3612 = vmatpush3.bf16.msra.mxu0 %v4041_v14 }
 0xae2   :  { %3591 = vmatprep.subr.bf16.mxu1 %v4042_v17  ;;  %3613 = vmatprep.subr.bf16.mxu0 %v4043_v45 }
 0xae5   :  { %3592 = vmatpush3.bf16.msra.mxu1 %v4044_v18  ;;  %3614 = vmatpush3.bf16.msra.mxu0 %v4045_v21 }
 0xae6   :  { %3593 = vmatprep.subr.bf16.mxu1 %v4046_v23  ;;  %3615 = vmatprep.subr.bf16.mxu0 %v4047_v24  ;;  %v4068_v23 = vld [vmem:[#allocation22 + $0x100] sm:$0xff]  }
 0xae7   :  { %v4069_v24 = vld [vmem:[#allocation22 + $0x180] sm:$0xff]  }
 0xae9   :  { %3594 = vmatpush3.bf16.msra.mxu1 %v4048_v25  ;;  %3616 = vmatpush3.bf16.msra.mxu0 %v4049_v42  ;;  %v4070_v25 = vld [vmem:[#allocation22 + $0x148] sm:$0xff]  }
 0xaea   :  { %3595 = vmatprep.subr.bf16.mxu1 %v4050_v26  ;;  %3617 = vmatprep.subr.bf16.mxu0 %v4051_v27  ;;  %v4071_v42 = vld [vmem:[#allocation22 + $0x1c8] sm:$0xff]  }
 0xaeb   :  { %v4072_v26 = vld [vmem:[#allocation22 + $0x108] sm:$0xff]  }
 0xaec   :  { %v4073_v27 = vld [vmem:[#allocation22 + $0x188] sm:$0xff]  }
 0xaed   :  { %3596 = vmatpush3.bf16.msra.mxu1 %v4052_v28  ;;  %3618 = vmatpush3.bf16.msra.mxu0 %v4053_v29  ;;  %v4074_v28 = vld [vmem:[#allocation22 + $0x150] sm:$0xff]  }
 0xaee   :  { %3597 = vmatprep.subr.bf16.mxu1 %v4054_v30  ;;  %3619 = vmatprep.subr.bf16.mxu0 %v4055_v31  ;;  %v4075_v29 = vld [vmem:[#allocation22 + $0x1d0] sm:$0xff]  }
 0xaef   :  { %v4076_v30 = vld [vmem:[#allocation22 + $0x110] sm:$0xff]  }
 0xaf0   :  { %v4077_v31 = vld [vmem:[#allocation22 + $0x190] sm:$0xff]  }
 0xaf1   :  { %3598 = vmatpush3.bf16.msra.mxu1 %v4056_v34  ;;  %3620 = vmatpush3.bf16.msra.mxu0 %v4057_v35  ;;  %v4078_v34 = vld [vmem:[#allocation22 + $0x158] sm:$0xff]  }
 0xaf2   :  { %3599 = vmatprep.subr.bf16.mxu1 %v4058_v32  ;;  %3621 = vmatprep.subr.bf16.mxu0 %v4059_v33  ;;  %v4079_v35 = vld [vmem:[#allocation22 + $0x1d8] sm:$0xff]  }
 0xaf3   :  { %v4080_v32 = vld [vmem:[#allocation22 + $0x118] sm:$0xff]  }
 0xaf4   :  { %v4081_v33 = vld [vmem:[#allocation22 + $0x198] sm:$0xff]  }
 0xaf5   :  { %3600 = vmatpush3.bf16.msra.mxu1 %v4060_v36  ;;  %3622 = vmatpush3.bf16.msra.mxu0 %v4061_v37  ;;  %v4082_v36 = vld [vmem:[#allocation22 + $0x160] sm:$0xff]  }
 0xaf6   :  { %3601 = vmatprep.subr.bf16.mxu1 %v4062_v38  ;;  %3623 = vmatprep.subr.bf16.mxu0 %v4063_v39  ;;  %v4083_v37 = vld [vmem:[#allocation22 + $0x1e0] sm:$0xff]  }
 0xaf7   :  { %v4084_v38 = vld [vmem:[#allocation22 + $0x120] sm:$0xff]  }
 0xaf8   :  { %v4085_v39 = vld [vmem:[#allocation22 + $0x1a0] sm:$0xff]  }
 0xaf9   :  { %3602 = vmatpush3.bf16.msra.mxu1 %v4064_v40  ;;  %3624 = vmatpush3.bf16.msra.mxu0 %v4065_v41  ;;  %v4086_v40 = vld [vmem:[#allocation22 + $0x168] sm:$0xff]  }
 0xafa   :  { %3631 = vmatprep.subr.bf16.mxu1 %v4066_v43  ;;  %3653 = vmatprep.subr.bf16.mxu0 %v4067_v44  ;;  %v4087_v41 = vld [vmem:[#allocation22 + $0x1e8] sm:$0xff]   ;;  %v1732_v43 = vsub.s32 4, %v5121_v10  ;;  %v1740_v44 = vsub.s32 6, %v5121_v10  ;;  %v4092_v10 = vld [vmem:[#allocation22 + $0x130] sm:$0xff]  }
 0xafc   :  { %v1733_v48 = vrot.slane %v5125_v19, %v1732_v43 }
 0xb8f   :  { %v2108_v52 = vpop.f32.mrb[44].mxu1  ;;  %v2151_v53 = vpop.f32.mrb[20].mxu0 }
 0xb90   :  { %v2109_v54 = vadd.f32 %v2108_v52, %v1717_v49  ;;  %v2152_v55 = vadd.f32 %v2151_v53, %v1725_v50  ;;  %v2110_v56 = vpop.f32.mrb[45].mxu1  ;;  %v2153_v57 = vpop.f32.mrb[21].mxu0  ;;  %v1745_v52 = vrot.slane %v5125_v19, %v1744_v12 }
 0xb91   :  { %v2111_v58 = vadd.f32 %v2110_v56, %v1721_v20  ;;  %v2154_v59 = vadd.f32 %v2153_v57, %v1729_v51  ;;  %v2112_v60 = vpop.f32.mrb[46].mxu1  ;;  %v2155_v61 = vpop.f32.mrb[22].mxu0 }
 0xb92   :  { %v2113_v62 = vadd.f32 %v2112_v60, %v1717_v49  ;;  %v2156_v63 = vadd.f32 %v2155_v61, %v1725_v50  ;;  %v2114_v1 = vpop.f32.mrb[47].mxu1  ;;  %v2157_v2 = vpop.f32.mrb[23].mxu0  ;;  %v2246_v5 = vmax.f32 %v2109_v54, 0.0  ;;  %v2248_v6 = vmax.f32 %v2152_v55, 0.0  ;;  %v4090_v50 = vld [vmem:[#allocation22 + $0x170] sm:$0xff]   ;;  %v4094_v60 = vld [vmem:[#allocation22 + $0x178] sm:$0xff]  }
 0xb93   :  { %v2115_v3 = vadd.f32 %v2114_v1, %v1721_v20  ;;  %v2158_v4 = vadd.f32 %v2157_v2, %v1729_v51  ;;  %v2247_v9 = vmax.f32 %v2111_v58, 0.0  ;;  %v2249_v11 = vmax.f32 %v2154_v59, 0.0  ;;  %v4091_v20 = vld [vmem:[#allocation22 + $0x1f0] sm:$0xff]   ;;  %v4095_v61 = vld [vmem:[#allocation22 + $0x1f8] sm:$0xff]  }
 0xb94   :  { %v2254_v7 = vmax.f32 %v2113_v62, 0.0  ;;  %v2256_v8 = vmax.f32 %v2156_v63, 0.0  ;;  %v1741_v49 = vrot.slane %v5125_v19, %v1740_v44  ;;  %v1737_v51 = vrot.slane %v5125_v19, %v1736_v15  ;;  %v4093_v55 = vld [vmem:[#allocation22 + $0x1b0] sm:$0xff]  }
 0xb95   :  { %v2255_v13 = vmax.f32 %v2115_v3, 0.0  ;;  %v2257_v14 = vmax.f32 %v2158_v4, 0.0 }
 0xb96   :  { %v2262_v17 = vpack.c.bf16 %v2254_v7, %v2246_v5  ;;  %v2264_v45 = vpack.c.bf16 %v2256_v8, %v2248_v6  ;;  %v4096_v8 = vld [vmem:[#allocation22 + $0x138] sm:$0xff]  }
 0xb97   :  { %v2263_v18 = vpack.c.bf16 %v2255_v13, %v2247_v9  ;;  %v2265_v21 = vpack.c.bf16 %v2257_v14, %v2249_v11  ;;  %v4097_v9 = vld [vmem:[#allocation22 + $0x1b8] sm:$0xff]  }
 0xb99   :  { %2821 = vmatprep.mubr.bf16.mxu1 %v2263_v18  ;;  %2862 = vmatprep.mubr.bf16.mxu0 %v2265_v21 }
 0xb9a   :  { %2822 = vmatmul.mubr.bf16.vlgmr.msra.gmra.mrb[52].mxu1 %v2262_v17  ;;  %2863 = vmatmul.mubr.bf16.vlgmr.msra.gmra.mrb[28].mxu0 %v2264_v45 }
 0xb9b   :  { %3632 = vmatpush3.bf16.msra.mxu1 %v4068_v23  ;;  %3654 = vmatpush3.bf16.msra.mxu0 %v4069_v24 }
 0xb9c   :  { %3633 = vmatprep.subr.bf16.mxu1 %v4070_v25  ;;  %3655 = vmatprep.subr.bf16.mxu0 %v4071_v42 }
 0xb9f   :  { %3634 = vmatpush3.bf16.msra.mxu1 %v4072_v26  ;;  %3656 = vmatpush3.bf16.msra.mxu0 %v4073_v27 }
 0xba0   :  { %3635 = vmatprep.subr.bf16.mxu1 %v4074_v28  ;;  %3657 = vmatprep.subr.bf16.mxu0 %v4075_v29  ;;  %v3414_v29 = vld [vmem:[#allocation23] ss:$0 sm:$0xff] }
 0xba3   :  { %3636 = vmatpush3.bf16.msra.mxu1 %v4076_v30  ;;  %3658 = vmatpush3.bf16.msra.mxu0 %v4077_v31 }
 0xba4   :  { %3637 = vmatprep.subr.bf16.mxu1 %v4078_v34  ;;  %3659 = vmatprep.subr.bf16.mxu0 %v4079_v35 }
 0xba7   :  { %3638 = vmatpush3.bf16.msra.mxu1 %v4080_v32  ;;  %3660 = vmatpush3.bf16.msra.mxu0 %v4081_v33 }
 0xba8   :  { %3639 = vmatprep.subr.bf16.mxu1 %v4082_v36  ;;  %3661 = vmatprep.subr.bf16.mxu0 %v4083_v37 }
 0xbab   :  { %3640 = vmatpush3.bf16.msra.mxu1 %v4084_v38  ;;  %3662 = vmatpush3.bf16.msra.mxu0 %v4085_v39 }
 0xbac   :  { %3641 = vmatprep.subr.bf16.mxu1 %v4086_v40  ;;  %3663 = vmatprep.subr.bf16.mxu0 %v4087_v41 }
 0xbaf   :  { %v2194_v53 = vpop.f32.mrb[48].mxu1  ;;  %v2237_v54 = vpop.f32.mrb[24].mxu0  ;;  %3642 = vmatpush3.bf16.msra.mxu1 %v4088_v46  ;;  %3664 = vmatpush3.bf16.msra.mxu0 %v4089_v47 }
 0xbb0   :  { %v2195_v56 = vadd.f32 %v2194_v53, %v1733_v48  ;;  %v2238_v57 = vadd.f32 %v2237_v54, %v1741_v49  ;;  %v2196_v58 = vpop.f32.mrb[49].mxu1  ;;  %v2239_v59 = vpop.f32.mrb[25].mxu0  ;;  %3643 = vmatprep.subr.bf16.mxu1 %v4090_v50  ;;  %3665 = vmatprep.subr.bf16.mxu0 %v4091_v20 }
 0xbb1   :  { %v2197_v62 = vadd.f32 %v2196_v58, %v1737_v51  ;;  %v2240_v63 = vadd.f32 %v2239_v59, %v1745_v52  ;;  %v2198_v1 = vpop.f32.mrb[50].mxu1  ;;  %v2241_v2 = vpop.f32.mrb[26].mxu0 }
 0xbb2   :  { %v2199_v3 = vadd.f32 %v2198_v1, %v1733_v48  ;;  %v2242_v19 = vadd.f32 %v2241_v2, %v1741_v49  ;;  %v2200_v4 = vpop.f32.mrb[51].mxu1  ;;  %v2243_v5 = vpop.f32.mrb[27].mxu0  ;;  %v2250_v11 = vmax.f32 %v2195_v56, 0.0  ;;  %v2252_v13 = vmax.f32 %v2238_v57, 0.0  ;;  %v4102_v1 = vld [vmem:[%s5235_s18 + $0x20] sm:$0xff]   ;;  %v4103_v2 = vld [vmem:[%s5235_s18 + $0x28] sm:$0xff]  }
 0xbb3   :  { %v2201_v6 = vadd.f32 %v2200_v4, %v1737_v51  ;;  %v2244_v7 = vadd.f32 %v2243_v5, %v1745_v52  ;;  %3644 = vmatpush3.bf16.msra.mxu1 %v4092_v10  ;;  %3666 = vmatpush3.bf16.msra.mxu0 %v4093_v55  ;;  %v2251_v45 = vmax.f32 %v2197_v62, 0.0  ;;  %v2253_v18 = vmax.f32 %v2240_v63, 0.0  ;;  %v4100_v62 = vld [vmem:[%s5235_s18 + $0x10] sm:$0xff]   ;;  %v4101_v63 = vld [vmem:[%s5235_s18 + $0x18] sm:$0xff]  }
 0xbb4   :  { %v2258_v14 = vmax.f32 %v2199_v3, 0.0  ;;  %v2260_v17 = vmax.f32 %v2242_v19, 0.0  ;;  %3645 = vmatprep.subr.bf16.mxu1 %v4094_v60  ;;  %3667 = vmatprep.subr.bf16.mxu0 %v4095_v61  ;;  %v4104_v3 = vld [vmem:[%s5235_s18 + $0x30] sm:$0xff]   ;;  %v4105_v19 = vld [vmem:[%s5235_s18 + $0x38] sm:$0xff]  }
 0xbb5   :  { %v2259_v21 = vmax.f32 %v2201_v6, 0.0  ;;  %v2261_v23 = vmax.f32 %v2244_v7, 0.0  ;;  %v4106_v4 = vld [vmem:[#allocation28] sm:$0xff]   ;;  %v4107_v5 = vld [vmem:[#allocation28 + $0x8] sm:$0xff]   ;;  %v4108_v6 = vld [vmem:[#allocation28 + $0x10] sm:$0xff]  }
 0xbb6   :  { %v2266_v24 = vpack.c.bf16 %v2258_v14, %v2250_v11  ;;  %v2268_v25 = vpack.c.bf16 %v2260_v17, %v2252_v13  ;;  %v4109_v7 = vld [vmem:[#allocation28 + $0x18] sm:$0xff]  }
 0xbb7   :  { %v2267_v42 = vpack.c.bf16 %v2259_v21, %v2251_v45  ;;  %v2269_v26 = vpack.c.bf16 %v2261_v23, %v2253_v18  ;;  %3646 = vmatpush3.bf16.msra.mxu1 %v4096_v8  ;;  %3668 = vmatpush3.bf16.msra.mxu0 %v4097_v9  ;;  %v4110_v8 = vld [vmem:[#allocation28 + $0x20] sm:$0xff]   ;;  %v4111_v9 = vld [vmem:[#allocation28 + $0x28] sm:$0xff]  }
 0xbb8   :  { %3901 = vmatprep.subr.bf16.mxu1 %v4579_v0  ;;  %3921 = vmatprep.subr.bf16.mxu0 %v4579_v0 }
 0xbb9   :  { %2903 = vmatprep.mubr.bf16.mxu1 %v2267_v42  ;;  %2944 = vmatprep.mubr.bf16.mxu0 %v2269_v26 }
 0xbba   :  { %2904 = vmatmul.mubr.bf16.vlgmr.msra.gmra.mrb[56].mxu1 %v2266_v24  ;;  %2945 = vmatmul.mubr.bf16.vlgmr.msra.gmra.mrb[32].mxu0 %v2268_v25 }
 0xbbb   :  { %3917 = vmatprep.mubr.msk.bf16.mxu1 %vm4580_vm0, %v4579_v0  ;;  %3937 = vmatprep.mubr.msk.bf16.mxu0 %vm4580_vm0, %v4579_v0 }
 0xbbc   :  { %3922 = vmatpush3.bf16.msra.mxu0 %v4106_v4 }
 0xbbd   :  { %3923 = vmatprep.subr.bf16.mxu0 %v4579_v0 }
 0xbc0   :  { %3924 = vmatpush3.bf16.msra.mxu0 %v4107_v5 }
 0xbc1   :  { %3925 = vmatprep.subr.bf16.mxu0 %v4579_v0 }
 0xbc4   :  { %3926 = vmatpush3.bf16.msra.mxu0 %v4108_v6 }
 0xbc5   :  { %3927 = vmatprep.subr.bf16.mxu0 %v4579_v0 }
 0xbc8   :  { %3928 = vmatpush3.bf16.msra.mxu0 %v4109_v7 }
 0xbc9   :  { %3929 = vmatprep.subr.bf16.mxu0 %v4579_v0 }
 0xbcc   :  { %3930 = vmatpush3.bf16.msra.mxu0 %v4110_v8 }
 0xbcd   :  { %3931 = vmatprep.subr.bf16.mxu0 %v4579_v0 }
 0xbd0   :  { %3932 = vmatpush3.bf16.msra.mxu0 %v4111_v9 }
 0xbd1   :  { %3933 = vmatprep.subr.bf16.mxu0 %v4579_v0 }
 0xc6d   :  { %v3603_v27 = vpop.f32.mrb[52].mxu1  ;;  %v3625_v28 = vpop.f32.mrb[28].mxu0 }
 0xc6e   :  { %v3604_v30 = vpop.f32.mrb[53].mxu1  ;;  %v3626_v31 = vpop.f32.mrb[29].mxu0 }
 0xc6f   :  { %v3605_v34 = vadd.f32 %v3604_v30, %v3603_v27  ;;  %v3627_v35 = vadd.f32 %v3626_v31, %v3625_v28  ;;  %v3606_v32 = vpop.f32.mrb[54].mxu1  ;;  %v3628_v33 = vpop.f32.mrb[30].mxu0  ;;  %v3479_v31 = vld [vmem:[#allocation25] ss:$0 sm:$0xff] }
 0xc70   :  { %v3607_v36 = vpop.f32.mrb[55].mxu1  ;;  %v3629_v37 = vpop.f32.mrb[31].mxu0 }
 0xc71   :  { %v2824_v38 = vadd.f32 %v3605_v34, %v3414_v29  ;;  %v3608_v39 = vadd.f32 %v3607_v36, %v3606_v32  ;;  %v3630_v40 = vadd.f32 %v3629_v37, %v3628_v33  ;;  %v3480_v33 = vld [vmem:[#allocation26] ss:$0 sm:$0xff] }
 0xc73   :  { %v2865_v41 = vadd.f32 %v3627_v35, %v2824_v38  ;;  %v2827_v43 = vadd.f32 %v3608_v39, %v3414_v29 }
 0xc75   :  { %v2868_v44 = vadd.f32 %v3630_v40, %v2827_v43 }
 0xc8d   :  { %v3647_v15 = vpop.f32.mrb[56].mxu1  ;;  %v3669_v12 = vpop.f32.mrb[32].mxu0 }
 0xc8e   :  { %v3648_v46 = vpop.f32.mrb[57].mxu1  ;;  %v3670_v47 = vpop.f32.mrb[33].mxu0 }
 0xc8f   :  { %v3649_v48 = vadd.f32 %v3648_v46, %v3647_v15  ;;  %v3671_v49 = vadd.f32 %v3670_v47, %v3669_v12  ;;  %v3650_v50 = vpop.f32.mrb[58].mxu1  ;;  %v3672_v20 = vpop.f32.mrb[34].mxu0 }
 0xc90   :  { %v3651_v51 = vpop.f32.mrb[59].mxu1  ;;  %v3673_v52 = vpop.f32.mrb[35].mxu0 }
 0xc91   :  { %v2906_v53 = vadd.f32 %v3649_v48, %v2865_v41  ;;  %v3652_v54 = vadd.f32 %v3651_v51, %v3650_v50  ;;  %v3674_v10 = vadd.f32 %v3673_v52, %v3672_v20 }
 0xc93   :  { %v2947_v55 = vadd.f32 %v3671_v49, %v2906_v53  ;;  %v2909_v56 = vadd.f32 %v3652_v54, %v2868_v44 }
 0xc95   :  { %v2950_v57 = vadd.f32 %v3674_v10, %v2909_v56  ;;  %v5148_v58 = vadd.f32 %v2947_v55, %v5104_v16  ;;  %v4098_v16 = vld [vmem:[%s5235_s18] sm:$0xff]  }
 0xc96   :  { %3902 = vmatpush3.bf16.msra.mxu1 %v4098_v16 }
 0xc97   :  { %2957 = vadd.xlane.f32.xlu0 %v5148_v58  ;;  %v5152_v59 = vadd.f32 %v2950_v57, %v5106_v22  ;;  %v2963_v60 = vmul.f32 %v5148_v58, %v5148_v58  ;;  %3903 = vmatprep.subr.bf16.mxu1 %v4579_v0  ;;  %v4099_v22 = vld [vmem:[%s5235_s18 + $0x8] sm:$0xff]  }
 0xc99   :  { %2959 = vadd.xlane.f32.xlu1 %v5152_v59  ;;  %v2964_v61 = vmul.f32 %v5152_v59, %v5152_v59 }
 0xc9a   :  { %3904 = vmatpush3.bf16.msra.mxu1 %v4099_v22 }
 0xc9b   :  { %2965 = vadd.xlane.f32.xlu0 %v2963_v60  ;;  %3905 = vmatprep.subr.bf16.mxu1 %v4579_v0  ;;  %v4113_v60 = vld [vmem:[#allocation28 + $0x38] sm:$0xff]  }
 0xc9d   :  { %2967 = vadd.xlane.f32.xlu1 %v2964_v61  ;;  %v3481_v61 = vld [vmem:[%s5236_s19] ss:$0 sm:$0xff]  ;;  %s4512_s19 = scalar_lea.vmem %s3255_s6, 32 }
 0xc9e   :  { %3906 = vmatpush3.bf16.msra.mxu1 %v4100_v62  ;;  %p4513_p10 = scmp.ne.s32.totalorder %s3255_s6, %s4512_s19  ;;  %p4518_p12 = scmp.lt.s32.totalorder %s4512_s19, %s4512_s19 }
 0xc9f   :  { %3907 = vmatprep.subr.bf16.mxu1 %v4579_v0 }
 0xca0   :  { %p4519_p13 = por %p4518_p12, %p4517_p11 }
 0xca2   :  { %3908 = vmatpush3.bf16.msra.mxu1 %v4101_v63  ;;  %p4520_p0 = pnand %p4519_p13, %p4513_p10 }
 0xca3   :  { %3909 = vmatprep.subr.bf16.mxu1 %v4579_v0 }
 0xca6   :  { %3910 = vmatpush3.bf16.msra.mxu1 %v4102_v1 }
 0xca7   :  { %3911 = vmatprep.subr.bf16.mxu1 %v4579_v0 }
 0xcaa   :  { %3912 = vmatpush3.bf16.msra.mxu1 %v4103_v2 }
 0xcab   :  { %3913 = vmatprep.subr.bf16.mxu1 %v4579_v0 }
 0xcae   :  { %3914 = vmatpush3.bf16.msra.mxu1 %v4104_v3 }
 0xcaf   :  { %3915 = vmatprep.subr.bf16.mxu1 %v4579_v0 }
 0xcb2   :  { %3916 = vmatpush3.bf16.msra.mxu1 %v4105_v19  ;;  %v3490_v19 = vld [vmem:[%s5238_s21] ss:$0 sm:$0xff] }
 0xd24   :  { %v2958_v11 = vpop.xlane.xlu0 %2957 }
 0xd25   :  { %v2961_v13 = vmul.f32 0.0125, %v2958_v11 }
 0xd26   :  { %v2960_v14 = vpop.xlane.xlu1 %2959 }
 0xd27   :  { %v2962_v17 = vmul.f32 0.0125, %v2960_v14  ;;  %v2971_v18 = vmul.f32 %v2961_v13, %v2961_v13  ;;  %v2975_v29 = vsub.f32 %v5148_v58, %v2961_v13 }
 0xd28   :  { %v2966_v45 = vpop.xlane.xlu0 %2965 }
 0xd29   :  { %v2969_v21 = vmul.f32 0.0125, %v2966_v45  ;;  %v2972_v24 = vmul.f32 %v2962_v17, %v2962_v17  ;;  %v2976_v34 = vsub.f32 %v5152_v59, %v2962_v17  ;;  %v4112_v59 = vld [vmem:[#allocation28 + $0x30] sm:$0xff]  }
 0xd2a   :  { %v2968_v23 = vpop.xlane.xlu1 %2967  ;;  %3934 = vmatpush3.bf16.msra.mxu0 %v4112_v59 }
 0xd2b   :  { %v2973_v25 = vsub.f32 %v2969_v21, %v2971_v18  ;;  %v2970_v42 = vmul.f32 0.0125, %v2968_v23  ;;  %3935 = vmatprep.subr.bf16.mxu0 %v4579_v0 }
 0xd2d   :  { %v2977_v26 = vadd.f32 1e-05, %v2973_v25  ;;  %v2974_v27 = vsub.f32 %v2970_v42, %v2972_v24 }
 0xd2e   :  { %3936 = vmatpush3.bf16.msra.mxu0 %v4113_v60 }
 0xd2f   :  { %4134 = vrsqrt.f32 %v2977_v26  ;;  %v2978_v28 = vadd.f32 1e-05, %v2974_v27 }
 0xd31   :  { %4136 = vrsqrt.f32 %v2978_v28 }
 0xd39   :  { %v4135_v30 = vpop.eup %4134 }
 0xd3a   :  { %v2981_v35 = vmul.f32 %v4135_v30, %v2975_v29 }
 0xd3b   :  { %v4137_v32 = vpop.eup %4136 }
 0xd3c   :  { %v2989_v36 = vmul.f32 %v3479_v31, %v2981_v35  ;;  %v2982_v37 = vmul.f32 %v4137_v32, %v2976_v34 }
 0xd3e   :  { %v2997_v38 = vadd.f32 %v3480_v33, %v2989_v36  ;;  %v2990_v39 = vmul.f32 %v3479_v31, %v2982_v37 }
 0xd40   :  { %v2998_v40 = vadd.f32 %v3480_v33, %v2990_v39  ;;  %v2999_v41 = vrot.slane %v2997_v38, 4 }
 0xd42   :  { %v3000_v43 = vadd.f32 %v2999_v41, %v2997_v38  ;;  %v3005_v44 = vrot.slane %v2998_v40, 4 }
 0xd44   :  { %v3001_v15 = vrot.slane %v3000_v43, 2  ;;  %v3006_v12 = vadd.f32 %v3005_v44, %v2998_v40 }
 0xd46   :  { %v3002_v46 = vadd.f32 %v3001_v15, %v3000_v43  ;;  %v3007_v47 = vrot.slane %v3006_v12, 2 }
 0xd48   :  { %v3003_v48 = vrot.slane %v3002_v46, 1  ;;  %v3008_v49 = vadd.f32 %v3007_v47, %v3006_v12 }
 0xd4a   :  { %v3004_v50 = vadd.f32 %v3003_v48, %v3002_v46  ;;  %v3009_v20 = vrot.slane %v3008_v49, 1 }
 0xd4c   :  { %v3010_v51 = vadd.f32 %v3009_v20, %v3008_v49  ;;  %v3011_v52 = vmul.f32 0.125, %v3004_v50 }
 0xd4e   :  { %v3012_v53 = vmul.f32 0.125, %v3010_v51  ;;  %v3013_v54 = vpack.c.bf16 %v3011_v52, %v3011_v52 }
 0xd50   :  { %v3014_v10 = vpack.c.bf16 %v3012_v53, %v3012_v53  ;;  %v3040_v55 = vunpack.c.l.b16 %v3013_v54 }
 0xd52   :  { %v3041_v56 = vunpack.c.l.b16 %v3014_v10 }
 0xd54   :  { %v3043_v57 = vsel %vm3042_vm3, %v3041_v56, %v3040_v55 }
 0xd55   :  { %v3044_v58 = vpack.c.b16 %v3043_v57, %v3043_v57 }
 0xd57   :  { %3918 = vmatmul.mubr.bf16.vlgmr.msra.gmra.mrb[60].mxu1 %v3044_v58 }
 0xe2a   :  { %v3128_v16 = vpop.f32.mrb[60].mxu1 }
 0xe2b   :  { %v3129_v22 = vadd.f32 %v3481_v61, %v3128_v16  ;;  %v3919_v62 = vpop.f32.mrb[61].mxu1 }
 0xe2c   :  { %v3131_v63 = vpop.f32.mrb[62].mxu1 }
 0xe2d   :  { %v3134_v1 = vmax.f32 %v3129_v22, 0.0  ;;  %v3920_v2 = vpop.f32.mrb[63].mxu1 }
 0xe2f   :  { %v3135_v3 = vpack.c.bf16 %v3134_v1, %v3134_v1 }
 0xe31   :  { %3938 = vmatmul.mubr.bf16.vlgmr.msra.gmra.mrb[36].mxu0 %v3135_v3 }
 0xf04   :  { %v3241_v0 = vpop.f32.mrb[36].mxu0 }
 0xf05   :  { %v3242_v4 = vadd.f32 %v3490_v19, %v3241_v0  ;;  %v3939_v5 = vpop.f32.mrb[37].mxu0 }
 0xf06   :  { %v3244_v6 = vpop.f32.mrb[38].mxu0 }
 0xf07   :  { %3247 = vst [vmem:[#allocation29] sm:$0x3] %v3242_v4  ;;  %v3940_v7 = vpop.f32.mrb[39].mxu0 }
 0xf08   :  { %4523 = shalt.err (!%p4520_p0)
}
 0xf09   :  { %s5269_s11 = sld [smem:[#allocation47_spill]] }
 0xf0f   :  { %s4524_s21 = scalar_lea.hbm %s5269_s11, 32 }
 0xf10   :  { %p4525_p1 = scmp.ne.s32.totalorder %s5269_s11, %s4524_s21  ;;  %p4528_p2 = scmp.lt.u32.totalorder %s4524_s21, %s5269_s11 }
 0xf12   :  { %p4530_p3 = pnand %p4528_p2, %p4525_p1 }
 0xf14   :  { %4533 = shalt.err (!%p4530_p3)
}
 0xf15   :  { %3257 = dma.vmem_to_hbm [thread:$0]  %s3255_s6, 32, %s5269_s11, [#allocation4]  }
 0xf16   :  { %4552 = dma.done.wait [#allocation4], 32  }
 0xf17   :  { %4553 = vsyncadd [#allocation4], 4294967264 }
 0xf18   :  { %3261 = vsyncpa [#allocation3], 1 }
 0xf19   :  { %3262 = vsyncpa [#allocation6], 1 }
 0xf1a   :  { %3263 = vsyncpa [#allocation9], 1 }
 0xf1b   :  { %3264 = vsyncpa [#allocation12], 1 }
 0xf1c   :  { %3265 = vsyncpa [#allocation15], 1 }
 0xf1d   :  { %3266 = vsyncpa [#allocation18], 1 }
 0xf1e   :  { %3267 = vsyncpa [#allocation21], 1 }
 0xf1f   :  { %3268 = vsyncpa [#allocation24], 1 }
 0xf20   :  { %3269 = vsyncpa [#allocation27], 1 }
 0xf21   :  { %3270 = vsyncpa [#allocation4], 1 }

</bundles_post_ra>
